<compile_context>
chip_gen: v6e
topology: v6e:2x2x1
jax: 0.10.0
libtpu: 0.0.40
codegen_flags: <defaults>
</compile_context>

<pallas_src>
import jax
import jax.numpy as jnp
from jax.experimental import pallas as pl
from jax.experimental.pallas import tpu as pltpu
import numpy as np

dropout = 0.3
hidden_size = 32
input_size = 10
seq_len = 5
num_layers = 3
batch_size = 2

# Cast MXU operands to bf16 (f32 accumulation). Cuts per-step matmul latency
# on the serial chain but loosens agreement with the f32 reference to ~1e-3,
# so it is gated off by default.
USE_BF16_MATMUL = False


def _wavefront_lstm_kernel(x_ref, wu_ref, bias_ref, h0_ref, c0_ref,
                           hs_ref, hout_ref, cout_ref):
    """All layers x all timesteps of the stacked LSTM in one kernel.

    x_ref    : (bs, T, D)   raw input, batch-major (exactly as given to forward)
    wu_ref   : (L*2H, 4H)   per-layer vstack([W_l zero-padded to H rows, U_l])
    bias_ref : (L*bs, 4H)   per-layer bias broadcast over the batch rows
    h0_ref   : (L, bs, H)   initial hidden states
    c0_ref   : (L, bs, H)   initial cell states
    hs_ref   : (bs, T, H)   last layer's hidden sequence
    hout_ref : (L, bs, H)   final hidden state per layer
    cout_ref : (L, bs, H)   final cell state per layer
    """
    bs, T, D = x_ref.shape
    L, _, H = h0_ref.shape

    # ---- hoisted loads / constants (off the recurrent critical path) ----
    WU = wu_ref[...]                                    # (L*2H, 4H)
    bias = bias_ref[...]                                # (L*bs, 4H)
    # Lane scale so a single sigmoid also yields tanh for the g-gate lanes:
    # tanh(x) = 2*sigmoid(2x) - 1.
    gscale = jnp.concatenate(
        [jnp.ones((1, 2 * H), jnp.float32),
         jnp.full((1, H), 2.0, jnp.float32),
         jnp.ones((1, H), jnp.float32)], axis=1)        # (1, 4H)

    x_val = x_ref[...]                                  # (bs, T, D)
    if D < H:                                           # pad features to H lanes
        x_val = jnp.concatenate(
            [x_val, jnp.zeros((bs, T, H - D), jnp.float32)], axis=2)
    x_t = [x_val[:, t, :] for t in range(T)]            # T x (bs, H), pre-sliced

    zero_in = jnp.zeros((bs, H), jnp.float32)
    zpad = {w: jnp.zeros((bs, w), jnp.float32)
            for w in {2 * H * k for k in range(1, L)}}  # hoisted zero blocks

    if USE_BF16_MATMUL:
        WU = WU.astype(jnp.bfloat16)

    h = [h0_ref[l] for l in range(L)]                   # per-layer (bs, H)
    c = [c0_ref[l] for l in range(L)]
    hs = [None] * T                                     # last layer's sequence

    # ---- wavefront: diagonal step s handles all (l, t) with l + t == s ----
    for s in range(L + T - 1):                          # 7 dependent steps
        active = [l for l in range(L) if 0 <= s - l < T]

        # Block-diagonal LHS (L*bs, L*2H); row-block l = [input_l, h_l],
        # where input_0 = x_t (feature padded) and input_l = h_{l-1} for l>0.
        rows = []
        for l in range(L):
            inp = (x_t[s] if s < T else zero_in) if l == 0 else h[l - 1]
            pieces = []
            if l > 0:
                pieces.append(zpad[2 * H * l])
            pieces += [inp, h[l]]
            if l < L - 1:
                pieces.append(zpad[2 * H * (L - 1 - l)])
            rows.append(jnp.concatenate(pieces, axis=1))
        lhs = jnp.concatenate(rows, axis=0)             # (L*bs, L*2H)
        if USE_BF16_MATMUL:
            lhs = lhs.astype(jnp.bfloat16)

        # ONE MXU push for every active layer's W and U contribution.
        gates = jnp.dot(lhs, WU, preferred_element_type=jnp.float32) + bias

        # Single sigmoid over the combined gates value; recover tanh(g) with
        # one VPU FMA.  Gate order matches torch .chunk(4): i, f, g, o.
        sg = jax.nn.sigmoid(gates * gscale)             # (L*bs, 4H)
        i_all = sg[:, 0 * H:1 * H]
        f_all = sg[:, 1 * H:2 * H]
        g_all = 2.0 * sg[:, 2 * H:3 * H] - 1.0
        o_all = sg[:, 3 * H:4 * H]

        c_cat = jnp.concatenate(c, axis=0)              # (L*bs, H)
        c_new = f_all * c_cat + i_all * g_all
        h_new = o_all * jnp.tanh(c_new)

        for l in active:                                # static (compile-time) selection
            c[l] = c_new[l * bs:(l + 1) * bs, :]
            h[l] = h_new[l * bs:(l + 1) * bs, :]
        if (L - 1) in active:
            hs[s - (L - 1)] = h[L - 1]

    # ---- coalesced epilogue stores (one bulk store per output) ----
    hs_ref[...] = jnp.stack(hs, axis=1)                 # (bs, T, H)
    hout_ref[...] = jnp.stack(h, axis=0)                # (L, bs, H)
    cout_ref[...] = jnp.stack(c, axis=0)                # (L, bs, H)


def multilayer_lstm(x, params, init_states=None):
    """MultiLayerCustomLSTM.forward (eval mode: dropout is identity)."""
    bs, T, D = x.shape
    H = params[0][1].shape[0]
    L = len(params)
    # Layer-0 features are zero-padded up to H lanes inside the kernel so every
    # layer's LHS block has the same (bs, 2H) shape; layer-0's W rows D:H are
    # zero-padded correspondingly, so the padding never affects the result.
    assert D <= H, "wavefront kernel assumes input_size <= hidden_size"

    # ---- weight packing: closure constants under jit -> constant-folded ----
    wu_blocks = []
    for (W, U, _) in params:
        Wp = jnp.zeros((H, 4 * H), jnp.float32).at[:W.shape[0], :].set(W)
        wu_blocks.append(jnp.concatenate([Wp, U], axis=0))          # (2H, 4H)
    WU = jnp.concatenate(wu_blocks, axis=0)                          # (L*2H, 4H)
    bias = jnp.concatenate(
        [jnp.broadcast_to(b.reshape(1, 4 * H), (bs, 4 * H)) for (_, _, b) in params],
        axis=0)                                                      # (L*bs, 4H)

    if init_states is None:
        h0s = jnp.zeros((L, bs, H), jnp.float32)
        c0s = jnp.zeros((L, bs, H), jnp.float32)
    else:
        h0s = jnp.stack([h for (h, _) in init_states])
        c0s = jnp.stack([c for (_, c) in init_states])

    vmem = pl.BlockSpec(memory_space=pltpu.MemorySpace.VMEM)
    # Gridless, fully VMEM-resident call (total footprint ~150 KiB << VMEM on
    # v5e/v6e/v7x).  Note: on v7x the second TensorCore is idle; add a batch
    # grid axis with dimension_semantics=("parallel",) if batch grows.
    hs, h_out, c_out = pl.pallas_call(
        _wavefront_lstm_kernel,
        out_shape=(
            jax.ShapeDtypeStruct((bs, T, H), jnp.float32),
            jax.ShapeDtypeStruct((L, bs, H), jnp.float32),
            jax.ShapeDtypeStruct((L, bs, H), jnp.float32),
        ),
        in_specs=[vmem] * 5,
        out_specs=(vmem, vmem, vmem),
    )(x, WU, bias, h0s, c0s)

    layer_states = [(h_out[i], c_out[i]) for i in range(L)]
    return hs, layer_states


def init_params(key, input_size, hidden_size, num_layers):
    """uniform(-0.1, 0.1) init, matching nn.init.uniform_(p, -0.1, 0.1)."""
    params = []
    for i in range(num_layers):
        d_in = input_size if i == 0 else hidden_size
        key, kw, ku, kb = jax.random.split(key, 4)
        W = jax.random.uniform(kw, (d_in, 4 * hidden_size), jnp.float32, -0.1, 0.1)
        U = jax.random.uniform(ku, (hidden_size, 4 * hidden_size), jnp.float32, -0.1, 0.1)
        b = jax.random.uniform(kb, (4 * hidden_size,), jnp.float32, -0.1, 0.1)
        params.append((W, U, b))
    return params


def _reference_multilayer_lstm(x, params):
    """Pure-JAX reference for correctness checking."""
    bs = x.shape[0]
    H = params[0][1].shape[0]
    layer_states = []
    for (W, U, b) in params:
        h = jnp.zeros((bs, H), jnp.float32)
        c = jnp.zeros((bs, H), jnp.float32)
        hs = []
        for t in range(x.shape[1]):
            gates = x[:, t, :] @ W + h @ U + b
            i = jax.nn.sigmoid(gates[:, 0 * H:1 * H])
            f = jax.nn.sigmoid(gates[:, 1 * H:2 * H])
            g = jnp.tanh(gates[:, 2 * H:3 * H])
            o = jax.nn.sigmoid(gates[:, 3 * H:4 * H])
            c = f * c + i * g
            h = o * jnp.tanh(c)
            hs.append(h)
        x = jnp.stack(hs, axis=1)
        layer_states.append((h, c))
    return x, layer_states


if __name__ == "__main__":
    key = jax.random.PRNGKey(0)
    key, kx = jax.random.split(key)
    x = jax.random.normal(kx, (batch_size, seq_len, input_size), jnp.float32)

    params = init_params(key, input_size, hidden_size, num_layers)

    fwd = jax.jit(lambda inp: multilayer_lstm(inp, params))
    out, layer_states = fwd(x)
    out = jax.block_until_ready(out)
    for h_t, c_t in layer_states:
        jax.block_until_ready(h_t)
        jax.block_until_ready(c_t)

    # Correctness check against the pure-JAX reference (f32 path everywhere;
    # the tanh-via-sigmoid identity is exact up to rounding).
    ref_out, ref_states = _reference_multilayer_lstm(x, params)
    np.testing.assert_allclose(np.asarray(out), np.asarray(ref_out),
                               rtol=1e-5, atol=1e-5)
    for (h, c), (rh, rc) in zip(layer_states, ref_states):
        np.testing.assert_allclose(np.asarray(h), np.asarray(rh), rtol=1e-5, atol=1e-5)
        np.testing.assert_allclose(np.asarray(c), np.asarray(rc), rtol=1e-5, atol=1e-5)

    assert out.shape == (batch_size, seq_len, hidden_size)
    print("KERNEL_OK")
</pallas_src>

<mosaic_0001>
module attributes {stable_mosaic.version = 11 : i64} {
  func.func @_wavefront_lstm_kernel(%arg0: memref<2x5x10xf32, #tpu.memory_space<vmem>>, %arg1: memref<192x128xf32, #tpu.memory_space<vmem>>, %arg2: memref<6x128xf32, #tpu.memory_space<vmem>>, %arg3: memref<3x2x32xf32, #tpu.memory_space<vmem>>, %arg4: memref<3x2x32xf32, #tpu.memory_space<vmem>>, %arg5: memref<2x5x32xf32, #tpu.memory_space<vmem>>, %arg6: memref<3x2x32xf32, #tpu.memory_space<vmem>>, %arg7: memref<3x2x32xf32, #tpu.memory_space<vmem>>) attributes {dimension_semantics = [], scalar_prefetch = 0 : i64, scratch_operands = 0 : i64, tpu.core_type = #tpu.core_type<tc>} {
    %c0 = arith.constant 0 : index
    %c0_0 = arith.constant 0 : index
    %0 = vector.load %arg1[%c0, %c0_0] : memref<192x128xf32, #tpu.memory_space<vmem>>, vector<192x128xf32>
    %c0_1 = arith.constant 0 : index
    %c0_2 = arith.constant 0 : index
    %1 = vector.load %arg2[%c0_1, %c0_2] : memref<6x128xf32, #tpu.memory_space<vmem>>, vector<6x128xf32>
    %cst = arith.constant 1.000000e+00 : f32
    %2 = vector.broadcast %cst : f32 to vector<1x64xf32>
    %cst_3 = arith.constant 2.000000e+00 : f32
    %3 = vector.broadcast %cst_3 : f32 to vector<1x32xf32>
    %cst_4 = arith.constant 1.000000e+00 : f32
    %4 = vector.broadcast %cst_4 : f32 to vector<1x32xf32>
    %5 = tpu.concatenate %2, %3, %4 in 1 : vector<1x64xf32>, vector<1x32xf32>, vector<1x32xf32> -> vector<1x128xf32>
    %c0_5 = arith.constant 0 : index
    %c0_6 = arith.constant 0 : index
    %c0_7 = arith.constant 0 : index
    %6 = vector.load %arg0[%c0_5, %c0_6, %c0_7] : memref<2x5x10xf32, #tpu.memory_space<vmem>>, vector<2x5x10xf32>
    %cst_8 = arith.constant 0.000000e+00 : f32
    %7 = vector.broadcast %cst_8 : f32 to vector<2x5x22xf32>
    %8 = tpu.concatenate %6, %7 in 2 : vector<2x5x10xf32>, vector<2x5x22xf32> -> vector<2x5x32xf32>
    %9 = vector.extract_strided_slice %8 {offsets = [0, 0, 0], sizes = [2, 1, 32], strides = [1, 1, 1]} : vector<2x5x32xf32> to vector<2x1x32xf32>
    %10 = vector.shape_cast %9 : vector<2x1x32xf32> to vector<2x32xf32>
    %11 = vector.extract_strided_slice %8 {offsets = [0, 1, 0], sizes = [2, 1, 32], strides = [1, 1, 1]} : vector<2x5x32xf32> to vector<2x1x32xf32>
    %12 = vector.shape_cast %11 : vector<2x1x32xf32> to vector<2x32xf32>
    %13 = vector.extract_strided_slice %8 {offsets = [0, 2, 0], sizes = [2, 1, 32], strides = [1, 1, 1]} : vector<2x5x32xf32> to vector<2x1x32xf32>
    %14 = vector.shape_cast %13 : vector<2x1x32xf32> to vector<2x32xf32>
    %15 = vector.extract_strided_slice %8 {offsets = [0, 3, 0], sizes = [2, 1, 32], strides = [1, 1, 1]} : vector<2x5x32xf32> to vector<2x1x32xf32>
    %16 = vector.shape_cast %15 : vector<2x1x32xf32> to vector<2x32xf32>
    %17 = vector.extract_strided_slice %8 {offsets = [0, 4, 0], sizes = [2, 1, 32], strides = [1, 1, 1]} : vector<2x5x32xf32> to vector<2x1x32xf32>
    %18 = vector.shape_cast %17 : vector<2x1x32xf32> to vector<2x32xf32>
    %cst_9 = arith.constant 0.000000e+00 : f32
    %19 = vector.broadcast %cst_9 : f32 to vector<2x32xf32>
    %cst_10 = arith.constant 0.000000e+00 : f32
    %20 = vector.broadcast %cst_10 : f32 to vector<2x64xf32>
    %cst_11 = arith.constant 0.000000e+00 : f32
    %21 = vector.broadcast %cst_11 : f32 to vector<2x128xf32>
    %c0_12 = arith.constant 0 : index
    %c0_13 = arith.constant 0 : index
    %c0_14 = arith.constant 0 : index
    %22 = vector.load %arg3[%c0_12, %c0_13, %c0_14] : memref<3x2x32xf32, #tpu.memory_space<vmem>>, vector<1x2x32xf32>
    %23 = vector.shape_cast %22 : vector<1x2x32xf32> to vector<2x32xf32>
    %c1 = arith.constant 1 : index
    %c0_15 = arith.constant 0 : index
    %c0_16 = arith.constant 0 : index
    %24 = vector.load %arg3[%c1, %c0_15, %c0_16] : memref<3x2x32xf32, #tpu.memory_space<vmem>>, vector<1x2x32xf32>
    %25 = vector.shape_cast %24 : vector<1x2x32xf32> to vector<2x32xf32>
    %c2 = arith.constant 2 : index
    %c0_17 = arith.constant 0 : index
    %c0_18 = arith.constant 0 : index
    %26 = vector.load %arg3[%c2, %c0_17, %c0_18] : memref<3x2x32xf32, #tpu.memory_space<vmem>>, vector<1x2x32xf32>
    %27 = vector.shape_cast %26 : vector<1x2x32xf32> to vector<2x32xf32>
    %c0_19 = arith.constant 0 : index
    %c0_20 = arith.constant 0 : index
    %c0_21 = arith.constant 0 : index
    %28 = vector.load %arg4[%c0_19, %c0_20, %c0_21] : memref<3x2x32xf32, #tpu.memory_space<vmem>>, vector<1x2x32xf32>
    %29 = vector.shape_cast %28 : vector<1x2x32xf32> to vector<2x32xf32>
    %c1_22 = arith.constant 1 : index
    %c0_23 = arith.constant 0 : index
    %c0_24 = arith.constant 0 : index
    %30 = vector.load %arg4[%c1_22, %c0_23, %c0_24] : memref<3x2x32xf32, #tpu.memory_space<vmem>>, vector<1x2x32xf32>
    %31 = vector.shape_cast %30 : vector<1x2x32xf32> to vector<2x32xf32>
    %c2_25 = arith.constant 2 : index
    %c0_26 = arith.constant 0 : index
    %c0_27 = arith.constant 0 : index
    %32 = vector.load %arg4[%c2_25, %c0_26, %c0_27] : memref<3x2x32xf32, #tpu.memory_space<vmem>>, vector<1x2x32xf32>
    %33 = vector.shape_cast %32 : vector<1x2x32xf32> to vector<2x32xf32>
    %34 = tpu.concatenate %10, %23, %21 in 1 : vector<2x32xf32>, vector<2x32xf32>, vector<2x128xf32> -> vector<2x192xf32>
    %35 = tpu.concatenate %20, %23, %25, %20 in 1 : vector<2x64xf32>, vector<2x32xf32>, vector<2x32xf32>, vector<2x64xf32> -> vector<2x192xf32>
    %36 = tpu.concatenate %21, %25, %27 in 1 : vector<2x128xf32>, vector<2x32xf32>, vector<2x32xf32> -> vector<2x192xf32>
    %37 = tpu.concatenate %34, %35, %36 in 0 : vector<2x192xf32>, vector<2x192xf32>, vector<2x192xf32> -> vector<6x192xf32>
    %cst_28 = arith.constant dense<0.000000e+00> : vector<6x128xf32>
    %38 = tpu.matmul %37, %0, %cst_28 {dimension_numbers = #tpu.dot_dimension_numbers<[1], [0], [0], [1], [0, 0, 1, 1], [], []>} : vector<6x192xf32>, vector<192x128xf32>, vector<6x128xf32> -> vector<6x128xf32>
    %39 = arith.addf %38, %1 : vector<6x128xf32>
    %40 = vector.broadcast %5 : vector<1x128xf32> to vector<6x128xf32>
    %41 = arith.mulf %39, %40 : vector<6x128xf32>
    %42 = arith.negf %41 : vector<6x128xf32>
    %43 = math.exp %42 : vector<6x128xf32>
    %cst_29 = arith.constant 1.000000e+00 : f32
    %44 = vector.broadcast %cst_29 : f32 to vector<6x128xf32>
    %45 = arith.addf %44, %43 : vector<6x128xf32>
    %46 = arith.divf %44, %45 : vector<6x128xf32>
    %47 = vector.extract_strided_slice %46 {offsets = [0, 0], sizes = [6, 32], strides = [1, 1]} : vector<6x128xf32> to vector<6x32xf32>
    %48 = vector.extract_strided_slice %46 {offsets = [0, 32], sizes = [6, 32], strides = [1, 1]} : vector<6x128xf32> to vector<6x32xf32>
    %49 = vector.extract_strided_slice %46 {offsets = [0, 64], sizes = [6, 32], strides = [1, 1]} : vector<6x128xf32> to vector<6x32xf32>
    %cst_30 = arith.constant 2.000000e+00 : f32
    %50 = vector.broadcast %cst_30 : f32 to vector<6x32xf32>
    %51 = arith.mulf %50, %49 : vector<6x32xf32>
    %cst_31 = arith.constant 1.000000e+00 : f32
    %52 = vector.broadcast %cst_31 : f32 to vector<6x32xf32>
    %53 = arith.subf %51, %52 : vector<6x32xf32>
    %54 = vector.extract_strided_slice %46 {offsets = [0, 96], sizes = [6, 32], strides = [1, 1]} : vector<6x128xf32> to vector<6x32xf32>
    %55 = tpu.concatenate %29, %31, %33 in 0 : vector<2x32xf32>, vector<2x32xf32>, vector<2x32xf32> -> vector<6x32xf32>
    %56 = arith.mulf %48, %55 : vector<6x32xf32>
    %57 = arith.mulf %47, %53 : vector<6x32xf32>
    %58 = arith.addf %56, %57 : vector<6x32xf32>
    %59 = math.tanh %58 : vector<6x32xf32>
    %60 = arith.mulf %54, %59 : vector<6x32xf32>
    %61 = vector.extract_strided_slice %58 {offsets = [0, 0], sizes = [2, 32], strides = [1, 1]} : vector<6x32xf32> to vector<2x32xf32>
    %62 = vector.extract_strided_slice %60 {offsets = [0, 0], sizes = [2, 32], strides = [1, 1]} : vector<6x32xf32> to vector<2x32xf32>
    %63 = tpu.concatenate %12, %62, %21 in 1 : vector<2x32xf32>, vector<2x32xf32>, vector<2x128xf32> -> vector<2x192xf32>
    %64 = tpu.concatenate %20, %62, %25, %20 in 1 : vector<2x64xf32>, vector<2x32xf32>, vector<2x32xf32>, vector<2x64xf32> -> vector<2x192xf32>
    %65 = tpu.concatenate %21, %25, %27 in 1 : vector<2x128xf32>, vector<2x32xf32>, vector<2x32xf32> -> vector<2x192xf32>
    %66 = tpu.concatenate %63, %64, %65 in 0 : vector<2x192xf32>, vector<2x192xf32>, vector<2x192xf32> -> vector<6x192xf32>
    %cst_32 = arith.constant dense<0.000000e+00> : vector<6x128xf32>
    %67 = tpu.matmul %66, %0, %cst_32 {dimension_numbers = #tpu.dot_dimension_numbers<[1], [0], [0], [1], [0, 0, 1, 1], [], []>} : vector<6x192xf32>, vector<192x128xf32>, vector<6x128xf32> -> vector<6x128xf32>
    %68 = arith.addf %67, %1 : vector<6x128xf32>
    %69 = vector.broadcast %5 : vector<1x128xf32> to vector<6x128xf32>
    %70 = arith.mulf %68, %69 : vector<6x128xf32>
    %71 = arith.negf %70 : vector<6x128xf32>
    %72 = math.exp %71 : vector<6x128xf32>
    %cst_33 = arith.constant 1.000000e+00 : f32
    %73 = vector.broadcast %cst_33 : f32 to vector<6x128xf32>
    %74 = arith.addf %73, %72 : vector<6x128xf32>
    %75 = arith.divf %73, %74 : vector<6x128xf32>
    %76 = vector.extract_strided_slice %75 {offsets = [0, 0], sizes = [6, 32], strides = [1, 1]} : vector<6x128xf32> to vector<6x32xf32>
    %77 = vector.extract_strided_slice %75 {offsets = [0, 32], sizes = [6, 32], strides = [1, 1]} : vector<6x128xf32> to vector<6x32xf32>
    %78 = vector.extract_strided_slice %75 {offsets = [0, 64], sizes = [6, 32], strides = [1, 1]} : vector<6x128xf32> to vector<6x32xf32>
    %cst_34 = arith.constant 2.000000e+00 : f32
    %79 = vector.broadcast %cst_34 : f32 to vector<6x32xf32>
    %80 = arith.mulf %79, %78 : vector<6x32xf32>
    %cst_35 = arith.constant 1.000000e+00 : f32
    %81 = vector.broadcast %cst_35 : f32 to vector<6x32xf32>
    %82 = arith.subf %80, %81 : vector<6x32xf32>
    %83 = vector.extract_strided_slice %75 {offsets = [0, 96], sizes = [6, 32], strides = [1, 1]} : vector<6x128xf32> to vector<6x32xf32>
    %84 = tpu.concatenate %61, %31, %33 in 0 : vector<2x32xf32>, vector<2x32xf32>, vector<2x32xf32> -> vector<6x32xf32>
    %85 = arith.mulf %77, %84 : vector<6x32xf32>
    %86 = arith.mulf %76, %82 : vector<6x32xf32>
    %87 = arith.addf %85, %86 : vector<6x32xf32>
    %88 = math.tanh %87 : vector<6x32xf32>
    %89 = arith.mulf %83, %88 : vector<6x32xf32>
    %90 = vector.extract_strided_slice %87 {offsets = [0, 0], sizes = [2, 32], strides = [1, 1]} : vector<6x32xf32> to vector<2x32xf32>
    %91 = vector.extract_strided_slice %89 {offsets = [0, 0], sizes = [2, 32], strides = [1, 1]} : vector<6x32xf32> to vector<2x32xf32>
    %92 = vector.extract_strided_slice %87 {offsets = [2, 0], sizes = [2, 32], strides = [1, 1]} : vector<6x32xf32> to vector<2x32xf32>
    %93 = vector.extract_strided_slice %89 {offsets = [2, 0], sizes = [2, 32], strides = [1, 1]} : vector<6x32xf32> to vector<2x32xf32>
    %94 = tpu.concatenate %14, %91, %21 in 1 : vector<2x32xf32>, vector<2x32xf32>, vector<2x128xf32> -> vector<2x192xf32>
    %95 = tpu.concatenate %20, %91, %93, %20 in 1 : vector<2x64xf32>, vector<2x32xf32>, vector<2x32xf32>, vector<2x64xf32> -> vector<2x192xf32>
    %96 = tpu.concatenate %21, %93, %27 in 1 : vector<2x128xf32>, vector<2x32xf32>, vector<2x32xf32> -> vector<2x192xf32>
    %97 = tpu.concatenate %94, %95, %96 in 0 : vector<2x192xf32>, vector<2x192xf32>, vector<2x192xf32> -> vector<6x192xf32>
    %cst_36 = arith.constant dense<0.000000e+00> : vector<6x128xf32>
    %98 = tpu.matmul %97, %0, %cst_36 {dimension_numbers = #tpu.dot_dimension_numbers<[1], [0], [0], [1], [0, 0, 1, 1], [], []>} : vector<6x192xf32>, vector<192x128xf32>, vector<6x128xf32> -> vector<6x128xf32>
    %99 = arith.addf %98, %1 : vector<6x128xf32>
    %100 = vector.broadcast %5 : vector<1x128xf32> to vector<6x128xf32>
    %101 = arith.mulf %99, %100 : vector<6x128xf32>
    %102 = arith.negf %101 : vector<6x128xf32>
    %103 = math.exp %102 : vector<6x128xf32>
    %cst_37 = arith.constant 1.000000e+00 : f32
    %104 = vector.broadcast %cst_37 : f32 to vector<6x128xf32>
    %105 = arith.addf %104, %103 : vector<6x128xf32>
    %106 = arith.divf %104, %105 : vector<6x128xf32>
    %107 = vector.extract_strided_slice %106 {offsets = [0, 0], sizes = [6, 32], strides = [1, 1]} : vector<6x128xf32> to vector<6x32xf32>
    %108 = vector.extract_strided_slice %106 {offsets = [0, 32], sizes = [6, 32], strides = [1, 1]} : vector<6x128xf32> to vector<6x32xf32>
    %109 = vector.extract_strided_slice %106 {offsets = [0, 64], sizes = [6, 32], strides = [1, 1]} : vector<6x128xf32> to vector<6x32xf32>
    %cst_38 = arith.constant 2.000000e+00 : f32
    %110 = vector.broadcast %cst_38 : f32 to vector<6x32xf32>
    %111 = arith.mulf %110, %109 : vector<6x32xf32>
    %cst_39 = arith.constant 1.000000e+00 : f32
    %112 = vector.broadcast %cst_39 : f32 to vector<6x32xf32>
    %113 = arith.subf %111, %112 : vector<6x32xf32>
    %114 = vector.extract_strided_slice %106 {offsets = [0, 96], sizes = [6, 32], strides = [1, 1]} : vector<6x128xf32> to vector<6x32xf32>
    %115 = tpu.concatenate %90, %92, %33 in 0 : vector<2x32xf32>, vector<2x32xf32>, vector<2x32xf32> -> vector<6x32xf32>
    %116 = arith.mulf %108, %115 : vector<6x32xf32>
    %117 = arith.mulf %107, %113 : vector<6x32xf32>
    %118 = arith.addf %116, %117 : vector<6x32xf32>
    %119 = math.tanh %118 : vector<6x32xf32>
    %120 = arith.mulf %114, %119 : vector<6x32xf32>
    %121 = vector.extract_strided_slice %118 {offsets = [0, 0], sizes = [2, 32], strides = [1, 1]} : vector<6x32xf32> to vector<2x32xf32>
    %122 = vector.extract_strided_slice %120 {offsets = [0, 0], sizes = [2, 32], strides = [1, 1]} : vector<6x32xf32> to vector<2x32xf32>
    %123 = vector.extract_strided_slice %118 {offsets = [2, 0], sizes = [2, 32], strides = [1, 1]} : vector<6x32xf32> to vector<2x32xf32>
    %124 = vector.extract_strided_slice %120 {offsets = [2, 0], sizes = [2, 32], strides = [1, 1]} : vector<6x32xf32> to vector<2x32xf32>
    %125 = vector.extract_strided_slice %118 {offsets = [4, 0], sizes = [2, 32], strides = [1, 1]} : vector<6x32xf32> to vector<2x32xf32>
    %126 = vector.extract_strided_slice %120 {offsets = [4, 0], sizes = [2, 32], strides = [1, 1]} : vector<6x32xf32> to vector<2x32xf32>
    %127 = tpu.concatenate %16, %122, %21 in 1 : vector<2x32xf32>, vector<2x32xf32>, vector<2x128xf32> -> vector<2x192xf32>
    %128 = tpu.concatenate %20, %122, %124, %20 in 1 : vector<2x64xf32>, vector<2x32xf32>, vector<2x32xf32>, vector<2x64xf32> -> vector<2x192xf32>
    %129 = tpu.concatenate %21, %124, %126 in 1 : vector<2x128xf32>, vector<2x32xf32>, vector<2x32xf32> -> vector<2x192xf32>
    %130 = tpu.concatenate %127, %128, %129 in 0 : vector<2x192xf32>, vector<2x192xf32>, vector<2x192xf32> -> vector<6x192xf32>
    %cst_40 = arith.constant dense<0.000000e+00> : vector<6x128xf32>
    %131 = tpu.matmul %130, %0, %cst_40 {dimension_numbers = #tpu.dot_dimension_numbers<[1], [0], [0], [1], [0, 0, 1, 1], [], []>} : vector<6x192xf32>, vector<192x128xf32>, vector<6x128xf32> -> vector<6x128xf32>
    %132 = arith.addf %131, %1 : vector<6x128xf32>
    %133 = vector.broadcast %5 : vector<1x128xf32> to vector<6x128xf32>
    %134 = arith.mulf %132, %133 : vector<6x128xf32>
    %135 = arith.negf %134 : vector<6x128xf32>
    %136 = math.exp %135 : vector<6x128xf32>
    %cst_41 = arith.constant 1.000000e+00 : f32
    %137 = vector.broadcast %cst_41 : f32 to vector<6x128xf32>
    %138 = arith.addf %137, %136 : vector<6x128xf32>
    %139 = arith.divf %137, %138 : vector<6x128xf32>
    %140 = vector.extract_strided_slice %139 {offsets = [0, 0], sizes = [6, 32], strides = [1, 1]} : vector<6x128xf32> to vector<6x32xf32>
    %141 = vector.extract_strided_slice %139 {offsets = [0, 32], sizes = [6, 32], strides = [1, 1]} : vector<6x128xf32> to vector<6x32xf32>
    %142 = vector.extract_strided_slice %139 {offsets = [0, 64], sizes = [6, 32], strides = [1, 1]} : vector<6x128xf32> to vector<6x32xf32>
    %cst_42 = arith.constant 2.000000e+00 : f32
    %143 = vector.broadcast %cst_42 : f32 to vector<6x32xf32>
    %144 = arith.mulf %143, %142 : vector<6x32xf32>
    %cst_43 = arith.constant 1.000000e+00 : f32
    %145 = vector.broadcast %cst_43 : f32 to vector<6x32xf32>
    %146 = arith.subf %144, %145 : vector<6x32xf32>
    %147 = vector.extract_strided_slice %139 {offsets = [0, 96], sizes = [6, 32], strides = [1, 1]} : vector<6x128xf32> to vector<6x32xf32>
    %148 = tpu.concatenate %121, %123, %125 in 0 : vector<2x32xf32>, vector<2x32xf32>, vector<2x32xf32> -> vector<6x32xf32>
    %149 = arith.mulf %141, %148 : vector<6x32xf32>
    %150 = arith.mulf %140, %146 : vector<6x32xf32>
    %151 = arith.addf %149, %150 : vector<6x32xf32>
    %152 = math.tanh %151 : vector<6x32xf32>
    %153 = arith.mulf %147, %152 : vector<6x32xf32>
    %154 = vector.extract_strided_slice %151 {offsets = [0, 0], sizes = [2, 32], strides = [1, 1]} : vector<6x32xf32> to vector<2x32xf32>
    %155 = vector.extract_strided_slice %153 {offsets = [0, 0], sizes = [2, 32], strides = [1, 1]} : vector<6x32xf32> to vector<2x32xf32>
    %156 = vector.extract_strided_slice %151 {offsets = [2, 0], sizes = [2, 32], strides = [1, 1]} : vector<6x32xf32> to vector<2x32xf32>
    %157 = vector.extract_strided_slice %153 {offsets = [2, 0], sizes = [2, 32], strides = [1, 1]} : vector<6x32xf32> to vector<2x32xf32>
    %158 = vector.extract_strided_slice %151 {offsets = [4, 0], sizes = [2, 32], strides = [1, 1]} : vector<6x32xf32> to vector<2x32xf32>
    %159 = vector.extract_strided_slice %153 {offsets = [4, 0], sizes = [2, 32], strides = [1, 1]} : vector<6x32xf32> to vector<2x32xf32>
    %160 = tpu.concatenate %18, %155, %21 in 1 : vector<2x32xf32>, vector<2x32xf32>, vector<2x128xf32> -> vector<2x192xf32>
    %161 = tpu.concatenate %20, %155, %157, %20 in 1 : vector<2x64xf32>, vector<2x32xf32>, vector<2x32xf32>, vector<2x64xf32> -> vector<2x192xf32>
    %162 = tpu.concatenate %21, %157, %159 in 1 : vector<2x128xf32>, vector<2x32xf32>, vector<2x32xf32> -> vector<2x192xf32>
    %163 = tpu.concatenate %160, %161, %162 in 0 : vector<2x192xf32>, vector<2x192xf32>, vector<2x192xf32> -> vector<6x192xf32>
    %cst_44 = arith.constant dense<0.000000e+00> : vector<6x128xf32>
    %164 = tpu.matmul %163, %0, %cst_44 {dimension_numbers = #tpu.dot_dimension_numbers<[1], [0], [0], [1], [0, 0, 1, 1], [], []>} : vector<6x192xf32>, vector<192x128xf32>, vector<6x128xf32> -> vector<6x128xf32>
    %165 = arith.addf %164, %1 : vector<6x128xf32>
    %166 = vector.broadcast %5 : vector<1x128xf32> to vector<6x128xf32>
    %167 = arith.mulf %165, %166 : vector<6x128xf32>
    %168 = arith.negf %167 : vector<6x128xf32>
    %169 = math.exp %168 : vector<6x128xf32>
    %cst_45 = arith.constant 1.000000e+00 : f32
    %170 = vector.broadcast %cst_45 : f32 to vector<6x128xf32>
    %171 = arith.addf %170, %169 : vector<6x128xf32>
    %172 = arith.divf %170, %171 : vector<6x128xf32>
    %173 = vector.extract_strided_slice %172 {offsets = [0, 0], sizes = [6, 32], strides = [1, 1]} : vector<6x128xf32> to vector<6x32xf32>
    %174 = vector.extract_strided_slice %172 {offsets = [0, 32], sizes = [6, 32], strides = [1, 1]} : vector<6x128xf32> to vector<6x32xf32>
    %175 = vector.extract_strided_slice %172 {offsets = [0, 64], sizes = [6, 32], strides = [1, 1]} : vector<6x128xf32> to vector<6x32xf32>
    %cst_46 = arith.constant 2.000000e+00 : f32
    %176 = vector.broadcast %cst_46 : f32 to vector<6x32xf32>
    %177 = arith.mulf %176, %175 : vector<6x32xf32>
    %cst_47 = arith.constant 1.000000e+00 : f32
    %178 = vector.broadcast %cst_47 : f32 to vector<6x32xf32>
    %179 = arith.subf %177, %178 : vector<6x32xf32>
    %180 = vector.extract_strided_slice %172 {offsets = [0, 96], sizes = [6, 32], strides = [1, 1]} : vector<6x128xf32> to vector<6x32xf32>
    %181 = tpu.concatenate %154, %156, %158 in 0 : vector<2x32xf32>, vector<2x32xf32>, vector<2x32xf32> -> vector<6x32xf32>
    %182 = arith.mulf %174, %181 : vector<6x32xf32>
    %183 = arith.mulf %173, %179 : vector<6x32xf32>
    %184 = arith.addf %182, %183 : vector<6x32xf32>
    %185 = math.tanh %184 : vector<6x32xf32>
    %186 = arith.mulf %180, %185 : vector<6x32xf32>
    %187 = vector.extract_strided_slice %184 {offsets = [0, 0], sizes = [2, 32], strides = [1, 1]} : vector<6x32xf32> to vector<2x32xf32>
    %188 = vector.extract_strided_slice %186 {offsets = [0, 0], sizes = [2, 32], strides = [1, 1]} : vector<6x32xf32> to vector<2x32xf32>
    %189 = vector.extract_strided_slice %184 {offsets = [2, 0], sizes = [2, 32], strides = [1, 1]} : vector<6x32xf32> to vector<2x32xf32>
    %190 = vector.extract_strided_slice %186 {offsets = [2, 0], sizes = [2, 32], strides = [1, 1]} : vector<6x32xf32> to vector<2x32xf32>
    %191 = vector.extract_strided_slice %184 {offsets = [4, 0], sizes = [2, 32], strides = [1, 1]} : vector<6x32xf32> to vector<2x32xf32>
    %192 = vector.extract_strided_slice %186 {offsets = [4, 0], sizes = [2, 32], strides = [1, 1]} : vector<6x32xf32> to vector<2x32xf32>
    %193 = tpu.concatenate %19, %188, %21 in 1 : vector<2x32xf32>, vector<2x32xf32>, vector<2x128xf32> -> vector<2x192xf32>
    %194 = tpu.concatenate %20, %188, %190, %20 in 1 : vector<2x64xf32>, vector<2x32xf32>, vector<2x32xf32>, vector<2x64xf32> -> vector<2x192xf32>
    %195 = tpu.concatenate %21, %190, %192 in 1 : vector<2x128xf32>, vector<2x32xf32>, vector<2x32xf32> -> vector<2x192xf32>
    %196 = tpu.concatenate %193, %194, %195 in 0 : vector<2x192xf32>, vector<2x192xf32>, vector<2x192xf32> -> vector<6x192xf32>
    %cst_48 = arith.constant dense<0.000000e+00> : vector<6x128xf32>
    %197 = tpu.matmul %196, %0, %cst_48 {dimension_numbers = #tpu.dot_dimension_numbers<[1], [0], [0], [1], [0, 0, 1, 1], [], []>} : vector<6x192xf32>, vector<192x128xf32>, vector<6x128xf32> -> vector<6x128xf32>
    %198 = arith.addf %197, %1 : vector<6x128xf32>
    %199 = vector.broadcast %5 : vector<1x128xf32> to vector<6x128xf32>
    %200 = arith.mulf %198, %199 : vector<6x128xf32>
    %201 = arith.negf %200 : vector<6x128xf32>
    %202 = math.exp %201 : vector<6x128xf32>
    %cst_49 = arith.constant 1.000000e+00 : f32
    %203 = vector.broadcast %cst_49 : f32 to vector<6x128xf32>
    %204 = arith.addf %203, %202 : vector<6x128xf32>
    %205 = arith.divf %203, %204 : vector<6x128xf32>
    %206 = vector.extract_strided_slice %205 {offsets = [0, 0], sizes = [6, 32], strides = [1, 1]} : vector<6x128xf32> to vector<6x32xf32>
    %207 = vector.extract_strided_slice %205 {offsets = [0, 32], sizes = [6, 32], strides = [1, 1]} : vector<6x128xf32> to vector<6x32xf32>
    %208 = vector.extract_strided_slice %205 {offsets = [0, 64], sizes = [6, 32], strides = [1, 1]} : vector<6x128xf32> to vector<6x32xf32>
    %cst_50 = arith.constant 2.000000e+00 : f32
    %209 = vector.broadcast %cst_50 : f32 to vector<6x32xf32>
    %210 = arith.mulf %209, %208 : vector<6x32xf32>
    %cst_51 = arith.constant 1.000000e+00 : f32
    %211 = vector.broadcast %cst_51 : f32 to vector<6x32xf32>
    %212 = arith.subf %210, %211 : vector<6x32xf32>
    %213 = vector.extract_strided_slice %205 {offsets = [0, 96], sizes = [6, 32], strides = [1, 1]} : vector<6x128xf32> to vector<6x32xf32>
    %214 = tpu.concatenate %187, %189, %191 in 0 : vector<2x32xf32>, vector<2x32xf32>, vector<2x32xf32> -> vector<6x32xf32>
    %215 = arith.mulf %207, %214 : vector<6x32xf32>
    %216 = arith.mulf %206, %212 : vector<6x32xf32>
    %217 = arith.addf %215, %216 : vector<6x32xf32>
    %218 = math.tanh %217 : vector<6x32xf32>
    %219 = arith.mulf %213, %218 : vector<6x32xf32>
    %220 = vector.extract_strided_slice %217 {offsets = [2, 0], sizes = [2, 32], strides = [1, 1]} : vector<6x32xf32> to vector<2x32xf32>
    %221 = vector.extract_strided_slice %219 {offsets = [2, 0], sizes = [2, 32], strides = [1, 1]} : vector<6x32xf32> to vector<2x32xf32>
    %222 = vector.extract_strided_slice %217 {offsets = [4, 0], sizes = [2, 32], strides = [1, 1]} : vector<6x32xf32> to vector<2x32xf32>
    %223 = vector.extract_strided_slice %219 {offsets = [4, 0], sizes = [2, 32], strides = [1, 1]} : vector<6x32xf32> to vector<2x32xf32>
    %224 = tpu.concatenate %19, %188, %21 in 1 : vector<2x32xf32>, vector<2x32xf32>, vector<2x128xf32> -> vector<2x192xf32>
    %225 = tpu.concatenate %20, %188, %221, %20 in 1 : vector<2x64xf32>, vector<2x32xf32>, vector<2x32xf32>, vector<2x64xf32> -> vector<2x192xf32>
    %226 = tpu.concatenate %21, %221, %223 in 1 : vector<2x128xf32>, vector<2x32xf32>, vector<2x32xf32> -> vector<2x192xf32>
    %227 = tpu.concatenate %224, %225, %226 in 0 : vector<2x192xf32>, vector<2x192xf32>, vector<2x192xf32> -> vector<6x192xf32>
    %cst_52 = arith.constant dense<0.000000e+00> : vector<6x128xf32>
    %228 = tpu.matmul %227, %0, %cst_52 {dimension_numbers = #tpu.dot_dimension_numbers<[1], [0], [0], [1], [0, 0, 1, 1], [], []>} : vector<6x192xf32>, vector<192x128xf32>, vector<6x128xf32> -> vector<6x128xf32>
    %229 = arith.addf %228, %1 : vector<6x128xf32>
    %230 = vector.broadcast %5 : vector<1x128xf32> to vector<6x128xf32>
    %231 = arith.mulf %229, %230 : vector<6x128xf32>
    %232 = arith.negf %231 : vector<6x128xf32>
    %233 = math.exp %232 : vector<6x128xf32>
    %cst_53 = arith.constant 1.000000e+00 : f32
    %234 = vector.broadcast %cst_53 : f32 to vector<6x128xf32>
    %235 = arith.addf %234, %233 : vector<6x128xf32>
    %236 = arith.divf %234, %235 : vector<6x128xf32>
    %237 = vector.extract_strided_slice %236 {offsets = [0, 0], sizes = [6, 32], strides = [1, 1]} : vector<6x128xf32> to vector<6x32xf32>
    %238 = vector.extract_strided_slice %236 {offsets = [0, 32], sizes = [6, 32], strides = [1, 1]} : vector<6x128xf32> to vector<6x32xf32>
    %239 = vector.extract_strided_slice %236 {offsets = [0, 64], sizes = [6, 32], strides = [1, 1]} : vector<6x128xf32> to vector<6x32xf32>
    %cst_54 = arith.constant 2.000000e+00 : f32
    %240 = vector.broadcast %cst_54 : f32 to vector<6x32xf32>
    %241 = arith.mulf %240, %239 : vector<6x32xf32>
    %cst_55 = arith.constant 1.000000e+00 : f32
    %242 = vector.broadcast %cst_55 : f32 to vector<6x32xf32>
    %243 = arith.subf %241, %242 : vector<6x32xf32>
    %244 = vector.extract_strided_slice %236 {offsets = [0, 96], sizes = [6, 32], strides = [1, 1]} : vector<6x128xf32> to vector<6x32xf32>
    %245 = tpu.concatenate %187, %220, %222 in 0 : vector<2x32xf32>, vector<2x32xf32>, vector<2x32xf32> -> vector<6x32xf32>
    %246 = arith.mulf %238, %245 : vector<6x32xf32>
    %247 = arith.mulf %237, %243 : vector<6x32xf32>
    %248 = arith.addf %246, %247 : vector<6x32xf32>
    %249 = math.tanh %248 : vector<6x32xf32>
    %250 = arith.mulf %244, %249 : vector<6x32xf32>
    %251 = vector.extract_strided_slice %248 {offsets = [4, 0], sizes = [2, 32], strides = [1, 1]} : vector<6x32xf32> to vector<2x32xf32>
    %252 = vector.extract_strided_slice %250 {offsets = [4, 0], sizes = [2, 32], strides = [1, 1]} : vector<6x32xf32> to vector<2x32xf32>
    %253 = vector.shape_cast %126 : vector<2x32xf32> to vector<2x1x32xf32>
    %254 = vector.shape_cast %159 : vector<2x32xf32> to vector<2x1x32xf32>
    %255 = vector.shape_cast %192 : vector<2x32xf32> to vector<2x1x32xf32>
    %256 = vector.shape_cast %223 : vector<2x32xf32> to vector<2x1x32xf32>
    %257 = vector.shape_cast %252 : vector<2x32xf32> to vector<2x1x32xf32>
    %258 = tpu.concatenate %253, %254, %255, %256, %257 in 1 : vector<2x1x32xf32>, vector<2x1x32xf32>, vector<2x1x32xf32>, vector<2x1x32xf32>, vector<2x1x32xf32> -> vector<2x5x32xf32>
    %c0_56 = arith.constant 0 : index
    %c0_57 = arith.constant 0 : index
    %c0_58 = arith.constant 0 : index
    %259 = vector.load %arg5[%c0_56, %c0_57, %c0_58] : memref<2x5x32xf32, #tpu.memory_space<vmem>>, vector<2x5x32xf32>
    tpu.vector_store %arg5[%c0_56, %c0_57, %c0_58], %258 {strides = array<i32>} : memref<2x5x32xf32, #tpu.memory_space<vmem>>, vector<2x5x32xf32>,
    %260 = vector.shape_cast %188 : vector<2x32xf32> to vector<1x2x32xf32>
    %261 = vector.shape_cast %221 : vector<2x32xf32> to vector<1x2x32xf32>
    %262 = vector.shape_cast %252 : vector<2x32xf32> to vector<1x2x32xf32>
    %263 = tpu.concatenate %260, %261, %262 in 0 : vector<1x2x32xf32>, vector<1x2x32xf32>, vector<1x2x32xf32> -> vector<3x2x32xf32>
    %c0_59 = arith.constant 0 : index
    %c0_60 = arith.constant 0 : index
    %c0_61 = arith.constant 0 : index
    %264 = vector.load %arg6[%c0_59, %c0_60, %c0_61] : memref<3x2x32xf32, #tpu.memory_space<vmem>>, vector<3x2x32xf32>
    tpu.vector_store %arg6[%c0_59, %c0_60, %c0_61], %263 {strides = array<i32>} : memref<3x2x32xf32, #tpu.memory_space<vmem>>, vector<3x2x32xf32>,
    %265 = vector.shape_cast %187 : vector<2x32xf32> to vector<1x2x32xf32>
    %266 = vector.shape_cast %220 : vector<2x32xf32> to vector<1x2x32xf32>
    %267 = vector.shape_cast %251 : vector<2x32xf32> to vector<1x2x32xf32>
    %268 = tpu.concatenate %265, %266, %267 in 0 : vector<1x2x32xf32>, vector<1x2x32xf32>, vector<1x2x32xf32> -> vector<3x2x32xf32>
    %c0_62 = arith.constant 0 : index
    %c0_63 = arith.constant 0 : index
    %c0_64 = arith.constant 0 : index
    %269 = vector.load %arg7[%c0_62, %c0_63, %c0_64] : memref<3x2x32xf32, #tpu.memory_space<vmem>>, vector<3x2x32xf32>
    tpu.vector_store %arg7[%c0_62, %c0_63, %c0_64], %268 {strides = array<i32>} : memref<3x2x32xf32, #tpu.memory_space<vmem>>, vector<3x2x32xf32>,
    return
  }
}

</mosaic_0001>

<bundles_post_ra>
// kernel: _lambda_.1
= control target key start
LH: loop header
LB: loop body
LE: loop exit
PB: predicated region body
PF: predicated region fallthrough
CT: control target
= control target key end

     0   :  { %13 = vsyncpa [#allocation3], 0  ;;  %s1374_s24 = smov [#allocation2]   ;;  %s2152_s0 = inlined_call_operand.vmem [shape: f32[2,5,10], index: 0, kind: input, shape index: {}]   ;;  %s2153_s1 = inlined_call_operand.hbm [shape: f32[192,128], index: 1, kind: input, shape index: {}]   ;;  %s2154_s2 = inlined_call_operand.vmem [shape: f32[6,128], index: 2, kind: input, shape index: {}]   ;;  %s2155_s3 = inlined_call_operand.vmem [shape: f32[3,2,32], index: 3, kind: input, shape index: {}, may-alias: {3,4}]   ;;  %s2156_s4 = inlined_call_operand.vmem [shape: f32[3,2,32], index: 4, kind: input, shape index: {}, may-alias: {3,4}]   ;;  %s2157_s5 = inlined_call_operand.vmem [shape: f32[2,5,32], index: 5, kind: output, shape index: {0}]   ;;  %s2158_s6 = inlined_call_operand.vmem [shape: f32[3,2,32], index: 6, kind: output, shape index: {1}]   ;;  %s2159_s7 = inlined_call_operand.vmem [shape: f32[3,2,32], index: 7, kind: output, shape index: {2}]  }
   0x1   :  { %s21_s25 = sshll.u32 %s1374_s24, 4  ;;  %s22_s25 = int_to_ptr.vmem [resolvable:$true] %s21_s25 }
   0x2   :  { %s1360_s26 = scalar_lea.vmem %s22_s25, 3072  ;;  %p1365_p1 = scmp.lt.s32.totalorder %s22_s25, %s22_s25 }
   0x3   :  { %p1361_p0 = scmp.ne.s32.totalorder %s22_s25, %s1360_s26  ;;  %p1366_p2 = scmp.lt.s32.totalorder %s1360_s26, %s1360_s26 }
   0x5   :  { %p1367_p3 = por %p1366_p2, %p1365_p1 }
   0x7   :  { %p1368_p4 = pnand %p1367_p3, %p1361_p0 }
   0x9   :  { %1371 = shalt.err (!%p1368_p4)
}
   0xa   :  { %s1375_s27 = smov 128   ;;  %s1376_s28 = smov 8  }
   0xb   :  { %27 = dma.hbm_to_vmem [thread:$0]  %s2153_s1, 3072, %s22_s25, [#allocation3], %s1375_s27, %s1375_s27, %s1376_s28  }
   0xc   :  { %1372 = dma.done.wait [#allocation3], 3072  }
   0xd   :  { %1373 = vsyncadd [#allocation3], 4294964224  ;;  %v1377_v0 = vmov 0.0   ;;  %v71_v1 = vld [vmem:[%s2155_s3] sm:$0x3]  ;;  %s1378_s12 = smov 64   ;;  %v198_v61 = vlaneseq }
   0xe   :  { %128 = vmatprep.subr.mxu0 %v1377_v0  ;;  %270 = vmatprep.subr.mxu1 %v1377_v0  ;;  %v1254_v2 = vld [vmem:[%s2155_s3 + $0x4] sm:$0x3]  ;;  %s1379_s13 = smov 32   ;;  %v1436_v3 = vld [vmem:[#allocation2 + $0x78] sm:$0xff]  ;;  %v1438_v4 = vld [vmem:[#allocation2 + $0x70] sm:$0xff]  ;;  %s1380_s15 = smov 96  }
   0xf   :  { %94 = vrot.lane.b32.xlu0 %v71_v1, %s1378_s12  ;;  %104 = vrot.lane.b32.xlu1 %v1254_v2, %s1379_s13  ;;  %v1443_v5 = vld [vmem:[%s2155_s3 + $0x2] sm:$0x3]  ;;  %v1450_v6 = vld [vmem:[#allocation2 + $0x68] sm:$0xff]  ;;  %v1463_v8 = vld [vmem:[#allocation2 + $0x58] sm:$0xff]  ;;  %vm119_vm0 = vcmask 1041408   ;;  %vm122_vm1 = vcmask 1043456  }
  0x10   :  { %129 = vmatpush1.msra.mxu0 %v1436_v3  ;;  %271 = vmatpush1.msra.mxu1 %v1436_v3  ;;  %v1457_v7 = vld [vmem:[#allocation2 + $0x60] sm:$0xff]  ;;  %v1467_v9 = vld [vmem:[#allocation2 + $0x50] sm:$0xff]  ;;  %v1490_v15 = vld [vmem:[#allocation2 + $0x48] sm:$0xff]  ;;  %vm68_vm2 = vcmask 80896   ;;  %v1617_v38 = vrot.slane %v1377_v0, 6  ;;  %v257_v39 = vrot.slane %v1377_v0, 1 }
  0x11   :  { %130 = vmatprep.subr.mxu0 %v1377_v0  ;;  %272 = vmatprep.subr.mxu1 %v1377_v0  ;;  %v76_v10 = vld [vmem:[%s2156_s4] sm:$0x3]  ;;  %v1477_v11 = vld [vmem:[%s2156_s4 + $0x2] sm:$0x3]  ;;  %v1482_v12 = vld [vmem:[%s2156_s4 + $0x4] sm:$0x3] }
  0x12   :  { %131 = vmatpush1.msra.mxu0 %v1438_v4  ;;  %273 = vmatpush1.msra.mxu1 %v1438_v4  ;;  %v212_v13 = vrot.slane %v1477_v11, 6  ;;  %v215_v14 = vrot.slane %v1482_v12, 4  ;;  %v1499_v17 = vld [vmem:[#allocation2 + $0x40] sm:$0xff]  ;;  %v1508_v19 = vld [vmem:[#allocation2 + $0x38] sm:$0xff]  ;;  %v1514_v20 = vld [vmem:[#allocation2 + $0x30] sm:$0xff]  ;;  %vm91_vm3 = vcmask 261120   ;;  %v264_v46 = vsel %vm119_vm0, %v257_v39, %v1617_v38 }
  0x13   :  { %98 = vrot.lane.b32.xlu0 %v1443_v5, %s1380_s15  ;;  %88 = vrot.lane.b32.xlu1 %v71_v1, %s1379_s13  ;;  %v1520_v21 = vld [vmem:[#allocation2 + $0x28] sm:$0xff]  ;;  %v1526_v22 = vld [vmem:[#allocation2 + $0x20] sm:$0xff]  ;;  %v1532_v23 = vld [vmem:[#allocation2 + $0x18] sm:$0xff]  ;;  %vm84_vm4 = vcmask 1041409   ;;  %vm62_vm5 = vcmask 523264   ;;  %v1631_v45 = vsel %vm119_vm0, 0.0, %v1617_v38 }
  0x14   :  { %132 = vmatprep.subr.mxu0 %v1377_v0  ;;  %274 = vmatprep.subr.mxu1 %v1377_v0  ;;  %v217_v16 = vsel %vm119_vm0, %v76_v10, %v212_v13  ;;  %v1538_v24 = vld [vmem:[#allocation2 + $0x10] sm:$0xff]  ;;  %v1544_v25 = vld [vmem:[#allocation2 + $0x8] sm:$0xff]  ;;  %v1550_v26 = vld [vmem:[#allocation2] sm:$0xff]  ;;  %vm64_vm6 = vcmask 785408   ;;  %v1649_v56 = vrot.slane %v1377_v0, 4  ;;  %v1703_v62 = vshrl.u32 %v198_v61, 7 }
  0x15   :  { %133 = vmatpush1.msra.mxu0 %v1450_v6  ;;  %275 = vmatpush1.msra.mxu1 %v1450_v6  ;;  %v218_v18 = vsel %vm122_vm1, %v217_v16, %v215_v14  ;;  %v1556_v27 = vld [vmem:[#allocation2 + $0xb8] sm:$0xff]  ;;  %v1562_v28 = vld [vmem:[#allocation2 + $0xb0] sm:$0xff]  ;;  %v1568_v29 = vld [vmem:[#allocation2 + $0xa8] sm:$0xff]  ;;  %v1381_v63 = vmov 2.0   ;;  %vm240_vm7 = vcmask 1042434   ;;  %vm374_vm8 = vcmask 1043459  }
  0x16   :  { %134 = vmatprep.subr.mxu0 %v1377_v0  ;;  %276 = vmatprep.subr.mxu1 %v1377_v0  ;;  %v1574_v30 = vld [vmem:[#allocation2 + $0xa0] sm:$0xff]  ;;  %v1580_v31 = vld [vmem:[#allocation2 + $0x98] sm:$0xff]  ;;  %v1586_v32 = vld [vmem:[#allocation2 + $0x90] sm:$0xff]  ;;  %v63_v1 = vsel %vm62_vm5, 1.0, %v1381_v63  ;;  %v1707_v2 = vsub.s32 0, %v1703_v62  ;;  %vm510_vm9 = vcmask 1044484  }
  0x17   :  { %135 = vmatpush1.msra.mxu0 %v1457_v7  ;;  %277 = vmatpush1.msra.mxu1 %v1457_v7  ;;  %v1592_v33 = vld [vmem:[#allocation2 + $0x88] sm:$0xff]  ;;  %v1598_v34 = vld [vmem:[#allocation2 + $0x80] sm:$0xff]  ;;  %vm1191_vm10 = vcmask 1040384   ;;  %vm649_vm11 = vcmask 1045509   ;;  %vm1196_vm12 = vcmask 1042432   ;;  %vm1219_vm13 = vcmask 254976  }
  0x18   :  { %136 = vmatprep.subr.mxu0 %v1377_v0  ;;  %278 = vmatprep.subr.mxu1 %v1377_v0  ;;  %v67_v35 = vld [vmem:[%s2152_s0 + $0x8] sm:$0x1f]  ;;  %v66_v37 = vld [vmem:[%s2152_s0] sm:$0x1f]  ;;  %vm1209_vm14 = vcmask 258048  }
  0x19   :  { %137 = vmatpush1.msra.mxu0 %v1463_v8  ;;  %279 = vmatpush1.msra.mxu1 %v1463_v8  ;;  %v70_v36 = vsel %vm68_vm2, %v67_v35, 0.0  ;;  %v1622_v41 = vsel %vm68_vm2, %v66_v37, 0.0  ;;  %v1713_v10 = vld [vmem:[%s2154_s2] sm:$0x3f] }
  0x1a   :  { %138 = vmatprep.subr.mxu0 %v1377_v0  ;;  %280 = vmatprep.subr.mxu1 %v1377_v0  ;;  %v1620_v40 = vrot.slane %v70_v36, 7 }
  0x1b   :  { %139 = vmatpush1.msra.mxu0 %v1467_v9  ;;  %281 = vmatpush1.msra.mxu1 %v1467_v9 }
  0x1c   :  { %140 = vmatprep.subr.mxu0 %v1377_v0  ;;  %282 = vmatprep.subr.mxu1 %v1377_v0  ;;  %v85_v48 = vsel %vm84_vm4, %v1620_v40, %v1622_v41  ;;  %v241_v63 = vsel %vm240_vm7, %v1620_v40, %v1622_v41 }
  0x1d   :  { %141 = vmatpush1.msra.mxu0 %v1490_v15  ;;  %220 = vrot.lane.b32.xlu1 %v218_v18, %s1379_s13 }
  0x1e   :  { %142 = vmatprep.subr.mxu0 %v1377_v0  ;;  %283 = vmatpush1.msra.mxu1 %v1490_v15 }
  0x1f   :  { %143 = vmatpush1.msra.mxu0 %v1499_v17  ;;  %284 = vmatprep.subr.mxu1 %v1377_v0 }
  0x20   :  { %144 = vmatprep.subr.mxu0 %v1377_v0  ;;  %285 = vmatpush1.msra.mxu1 %v1499_v17 }
  0x21   :  { %145 = vmatpush1.msra.mxu0 %v1508_v19  ;;  %286 = vmatprep.subr.mxu1 %v1377_v0 }
  0x22   :  { %146 = vmatprep.subr.mxu0 %v1377_v0  ;;  %287 = vmatpush1.msra.mxu1 %v1508_v19 }
  0x23   :  { %147 = vmatpush1.msra.mxu0 %v1514_v20  ;;  %288 = vmatprep.subr.mxu1 %v1377_v0 }
  0x24   :  { %148 = vmatprep.subr.mxu0 %v1377_v0  ;;  %289 = vmatpush1.msra.mxu1 %v1514_v20 }
  0x25   :  { %149 = vmatpush1.msra.mxu0 %v1520_v21  ;;  %290 = vmatprep.subr.mxu1 %v1377_v0 }
  0x26   :  { %150 = vmatprep.subr.mxu0 %v1377_v0  ;;  %291 = vmatpush1.msra.mxu1 %v1520_v21 }
  0x27   :  { %151 = vmatpush1.msra.mxu0 %v1526_v22  ;;  %292 = vmatprep.subr.mxu1 %v1377_v0 }
  0x28   :  { %152 = vmatprep.subr.mxu0 %v1377_v0  ;;  %293 = vmatpush1.msra.mxu1 %v1526_v22 }
  0x29   :  { %153 = vmatpush1.msra.mxu0 %v1532_v23  ;;  %294 = vmatprep.subr.mxu1 %v1377_v0 }
  0x2a   :  { %154 = vmatprep.subr.mxu0 %v1377_v0  ;;  %295 = vmatpush1.msra.mxu1 %v1532_v23 }
  0x2b   :  { %155 = vmatpush1.msra.mxu0 %v1538_v24  ;;  %296 = vmatprep.subr.mxu1 %v1377_v0 }
  0x2c   :  { %156 = vmatprep.subr.mxu0 %v1377_v0  ;;  %297 = vmatpush1.msra.mxu1 %v1538_v24 }
  0x2d   :  { %157 = vmatpush1.msra.mxu0 %v1544_v25  ;;  %298 = vmatprep.subr.mxu1 %v1377_v0 }
  0x2e   :  { %158 = vmatprep.subr.mxu0 %v1377_v0  ;;  %299 = vmatpush1.msra.mxu1 %v1544_v25 }
  0x2f   :  { %159 = vmatpush1.msra.mxu0 %v1550_v26  ;;  %300 = vmatprep.subr.mxu1 %v1377_v0 }
  0x30   :  { %176 = vmatprep.subr.mxu0 %v1377_v0  ;;  %301 = vmatpush1.msra.mxu1 %v1550_v26 }
  0x31   :  { %177 = vmatpush2.msra.mxu0 %v1556_v27  ;;  %318 = vmatprep.subr.mxu1 %v1377_v0 }
  0x32   :  { %178 = vmatprep.subr.mxu0 %v1377_v0  ;;  %319 = vmatpush2.msra.mxu1 %v1556_v27 }
  0x33   :  { %179 = vmatpush2.msra.mxu0 %v1562_v28  ;;  %320 = vmatprep.subr.mxu1 %v1377_v0 }
  0x34   :  { %180 = vmatprep.subr.mxu0 %v1377_v0  ;;  %321 = vmatpush2.msra.mxu1 %v1562_v28 }
  0x35   :  { %181 = vmatpush2.msra.mxu0 %v1568_v29  ;;  %322 = vmatprep.subr.mxu1 %v1377_v0 }
  0x36   :  { %182 = vmatprep.subr.mxu0 %v1377_v0  ;;  %323 = vmatpush2.msra.mxu1 %v1568_v29 }
  0x37   :  { %183 = vmatpush2.msra.mxu0 %v1574_v30  ;;  %324 = vmatprep.subr.mxu1 %v1377_v0 }
  0x38   :  { %184 = vmatprep.subr.mxu0 %v1377_v0  ;;  %325 = vmatpush2.msra.mxu1 %v1574_v30 }
  0x39   :  { %185 = vmatpush2.msra.mxu0 %v1580_v31  ;;  %326 = vmatprep.subr.mxu1 %v1377_v0 }
  0x3a   :  { %186 = vmatprep.subr.mxu0 %v1377_v0  ;;  %327 = vmatpush2.msra.mxu1 %v1580_v31 }
  0x3b   :  { %187 = vmatpush2.msra.mxu0 %v1586_v32  ;;  %328 = vmatprep.subr.mxu1 %v1377_v0 }
  0x3c   :  { %188 = vmatprep.subr.mxu0 %v1377_v0  ;;  %329 = vmatpush2.msra.mxu1 %v1586_v32 }
  0x3d   :  { %189 = vmatpush2.msra.mxu0 %v1592_v33  ;;  %330 = vmatprep.subr.mxu1 %v1377_v0 }
  0x3e   :  { %190 = vmatprep.subr.mxu0 %v1377_v0  ;;  %331 = vmatpush2.msra.mxu1 %v1592_v33 }
  0x3f   :  { %191 = vmatpush2.msra.mxu0 %v1598_v34  ;;  %332 = vmatprep.subr.mxu1 %v1377_v0 }
  0x40   :  { %333 = vmatpush2.msra.mxu1 %v1598_v34  ;;  %413 = vmatprep.subr.mxu0 %v1377_v0 }
  0x41   :  { %553 = vmatprep.subr.mxu1 %v1377_v0 }
  0x81   :  { %v95_v42 = vpop.permute.xlu0 %94  ;;  %v1624_v43 = vpop.permute.xlu1 %104 }
  0x82   :  { %v107_v44 = vsel %vm91_vm3, %v1443_v5, %v1624_v43  ;;  %v101_v49 = vsel %vm62_vm5, 0.0, %v95_v42  ;;  %v65_v5 = vsel %vm64_vm6, %v63_v1, 1.0 }
  0x83   :  { %v116_v47 = vrot.slane %v107_v44, 4  ;;  %v1716_v16 = vrot.slane %v65_v5, %v1707_v2 }
  0x85   :  { %v1638_v50 = vpop.permute.xlu0 %98  ;;  %v89_v51 = vpop.permute.xlu1 %88  ;;  %v124_v52 = vsel %vm122_vm1, %v1631_v45, %v116_v47  ;;  %v266_v53 = vsel %vm122_vm1, %v264_v46, %v116_v47 }
  0x86   :  { %v102_v54 = vsel %vm64_vm6, %v101_v49, %v1638_v50  ;;  %v92_v55 = vsel %vm91_vm3, %v85_v48, %v89_v51  ;;  %1257 = vmatprep.mubr.msk.f32.mxu0 %vm62_vm5, %v124_v52  ;;  %1260 = vmatprep.mubr.msk.f32.mxu1 %vm62_vm5, %v266_v53 }
  0x87   :  { %v110_v57 = vrot.slane %v102_v54, 6  ;;  %v93_v58 = vsel %vm62_vm5, %v92_v55, 0.0 }
  0x89   :  { %v120_v59 = vsel %vm119_vm0, %v93_v58, %v110_v57 }
  0x8a   :  { %v123_v60 = vsel %vm122_vm1, %v120_v59, %v1649_v56 }
  0x8b   :  { %193 = vmatmul.mubr.f32.vlgmr.msra.gmra.mxu0 %v123_v60 }
  0x8c   :  { %414 = vmatpush1.msra.mxu0 %v1436_v3 }
  0x8d   :  { %415 = vmatprep.subr.mxu0 %v1377_v0 }
  0x8e   :  { %416 = vmatpush1.msra.mxu0 %v1438_v4 }
  0x8f   :  { %417 = vmatprep.subr.mxu0 %v1377_v0  ;;  %v221_v52 = vpop.permute.xlu1 %220 }
  0x90   :  { %418 = vmatpush1.msra.mxu0 %v1450_v6 }
  0x91   :  { %419 = vmatprep.subr.mxu0 %v1377_v0 }
  0x92   :  { %420 = vmatpush1.msra.mxu0 %v1457_v7 }
  0x93   :  { %421 = vmatprep.subr.mxu0 %v1377_v0 }
  0x94   :  { %422 = vmatpush1.msra.mxu0 %v1463_v8 }
  0x95   :  { %423 = vmatprep.subr.mxu0 %v1377_v0 }
  0x96   :  { %424 = vmatpush1.msra.mxu0 %v1467_v9 }
  0x97   :  { %425 = vmatprep.subr.mxu0 %v1377_v0 }
  0x98   :  { %426 = vmatpush1.msra.mxu0 %v1490_v15 }
  0x99   :  { %427 = vmatprep.subr.mxu0 %v1377_v0 }
  0x9a   :  { %428 = vmatpush1.msra.mxu0 %v1499_v17 }
  0x9b   :  { %429 = vmatprep.subr.mxu0 %v1377_v0 }
  0x9c   :  { %430 = vmatpush1.msra.mxu0 %v1508_v19 }
  0x9d   :  { %431 = vmatprep.subr.mxu0 %v1377_v0 }
  0x9e   :  { %432 = vmatpush1.msra.mxu0 %v1514_v20 }
  0x9f   :  { %433 = vmatprep.subr.mxu0 %v1377_v0 }
  0xa0   :  { %434 = vmatpush1.msra.mxu0 %v1520_v21 }
  0xa1   :  { %435 = vmatprep.subr.mxu0 %v1377_v0 }
  0xa2   :  { %436 = vmatpush1.msra.mxu0 %v1526_v22 }
  0xa3   :  { %437 = vmatprep.subr.mxu0 %v1377_v0 }
  0xa4   :  { %438 = vmatpush1.msra.mxu0 %v1532_v23 }
  0xa5   :  { %439 = vmatprep.subr.mxu0 %v1377_v0 }
  0xa6   :  { %440 = vmatpush1.msra.mxu0 %v1538_v24 }
  0xa7   :  { %441 = vmatprep.subr.mxu0 %v1377_v0 }
  0xa8   :  { %442 = vmatpush1.msra.mxu0 %v1544_v25 }
  0xa9   :  { %443 = vmatprep.subr.mxu0 %v1377_v0 }
  0xaa   :  { %444 = vmatpush1.msra.mxu0 %v1550_v26 }
  0xab   :  { %461 = vmatprep.subr.mxu0 %v1377_v0 }
  0xac   :  { %462 = vmatpush2.msra.mxu0 %v1556_v27 }
  0xad   :  { %463 = vmatprep.subr.mxu0 %v1377_v0 }
  0xae   :  { %464 = vmatpush2.msra.mxu0 %v1562_v28 }
  0xaf   :  { %465 = vmatprep.subr.mxu0 %v1377_v0 }
  0xb0   :  { %466 = vmatpush2.msra.mxu0 %v1568_v29 }
  0xb1   :  { %467 = vmatprep.subr.mxu0 %v1377_v0 }
  0xb2   :  { %468 = vmatpush2.msra.mxu0 %v1574_v30 }
  0xb3   :  { %469 = vmatprep.subr.mxu0 %v1377_v0 }
  0xb4   :  { %470 = vmatpush2.msra.mxu0 %v1580_v31 }
  0xb5   :  { %471 = vmatprep.subr.mxu0 %v1377_v0 }
  0xb6   :  { %472 = vmatpush2.msra.mxu0 %v1586_v32 }
  0xb7   :  { %473 = vmatprep.subr.mxu0 %v1377_v0 }
  0xb8   :  { %474 = vmatpush2.msra.mxu0 %v1592_v33 }
  0xb9   :  { %475 = vmatprep.subr.mxu0 %v1377_v0 }
  0xba   :  { %476 = vmatpush2.msra.mxu0 %v1598_v34 }
  0xbb   :  { %686 = vmatprep.subr.mxu0 %v1377_v0 }
 0x14b   :  { %v194_v18 = vpop.f32.mrf.mxu0 }
 0x14c   :  { %v195_v35 = vadd.f32 %v194_v18, %v1713_v10 }
 0x14d   :  { %v196_v36 = vpop.f32.mrf.mxu0 }
 0x14e   :  { %v202_v37 = vmul.f32 %v1716_v16, %v195_v35 }
 0x150   :  { %v1258_v39 = vmul.f32 -1.442695, %v202_v37 }
 0x152   :  { %1287 = vpow2.f32 %v1258_v39 }
 0x15f   :  { %v1288_v42 = vpop.eup %1287 }
 0x160   :  { %v206_v44 = vadd.f32 1.0, %v1288_v42 }
 0x162   :  { %1289 = vrcp.f32 %v206_v44 }
 0x16f   :  { %v1290_v46 = vpop.eup %1289 }
 0x170   :  { %v209_v47 = vmul.f32 2.0, %v1290_v46  ;;  %v223_v53 = vmul.f32 %v1290_v46, %v221_v52 }
 0x172   :  { %v1259_v48 = vadd.f32 -1.0, %v209_v47 }
 0x174   :  { %225 = vrot.lane.b32.xlu0 %v1259_v48, %s1378_s12 }
 0x1e6   :  { %v226_v49 = vpop.permute.xlu0 %225 }
 0x1e7   :  { %v228_v51 = vmul.f32 %v1290_v46, %v226_v49 }
 0x1e9   :  { %230 = vrot.lane.b32.xlu0 %v228_v51, %s1379_s13 }
 0x25b   :  { %v231_v54 = vpop.permute.xlu0 %230 }
 0x25c   :  { %v1722_v55 = vadd.f32 %v231_v54, %v223_v53 }
 0x25e   :  { %1291 = vtanh.f32 %v1722_v55 }
 0x26b   :  { %v1292_v57 = vpop.eup %1291 }
 0x26c   :  { %236 = vrot.lane.b32.xlu1 %v1292_v57, %s1378_s12 }
 0x2de   :  { %v237_v58 = vpop.permute.xlu1 %236 }
 0x2df   :  { %v239_v59 = vmul.f32 %v1290_v46, %v237_v58 }
 0x2e1   :  { %v244_v60 = vrot.slane %v239_v59, 7  ;;  %250 = vrot.lane.b32.xlu1 %v239_v59, %s1380_s15 }
 0x2e3   :  { %245 = vrot.lane.b32.xlu0 %v244_v60, %s1378_s12 }
 0x2e5   :  { %349 = vrot.lane.b32.xlu1 %v212_v13, %s1379_s13 }
 0x353   :  { %v251_v61 = vpop.permute.xlu1 %250 }
 0x354   :  { %v253_v1 = vsel %vm62_vm5, 0.0, %v251_v61 }
 0x355   :  { %v254_v5 = vsel %vm64_vm6, %v253_v1, %v1638_v50  ;;  %v246_v18 = vpop.permute.xlu0 %245 }
 0x356   :  { %v248_v35 = vsel %vm91_vm3, %v241_v63, %v246_v18  ;;  %v261_v37 = vrot.slane %v254_v5, 6 }
 0x357   :  { %v249_v36 = vsel %vm62_vm5, %v248_v35, 0.0  ;;  %v350_v58 = vpop.permute.xlu1 %349 }
 0x358   :  { %v256_v39 = vrot.slane %v249_v36, 1  ;;  %v355_v60 = vsel %vm119_vm0, %v1722_v55, %v350_v58 }
 0x35a   :  { %v263_v11 = vsel %vm119_vm0, %v256_v39, %v261_v37  ;;  %v375_v37 = vsel %vm374_vm8, %v1620_v40, %v1622_v41 }
 0x35b   :  { %v265_v13 = vsel %vm122_vm1, %v263_v11, %v1649_v56 }
 0x35c   :  { %335 = vmatmul.mubr.f32.vlgmr.msra.gmra.mxu1 %v265_v13 }
 0x35d   :  { %554 = vmatpush1.msra.mxu1 %v1436_v3 }
 0x35e   :  { %555 = vmatprep.subr.mxu1 %v1377_v0 }
 0x35f   :  { %556 = vmatpush1.msra.mxu1 %v1438_v4 }
 0x360   :  { %557 = vmatprep.subr.mxu1 %v1377_v0 }
 0x361   :  { %558 = vmatpush1.msra.mxu1 %v1450_v6 }
 0x362   :  { %559 = vmatprep.subr.mxu1 %v1377_v0 }
 0x363   :  { %560 = vmatpush1.msra.mxu1 %v1457_v7 }
 0x364   :  { %561 = vmatprep.subr.mxu1 %v1377_v0 }
 0x365   :  { %562 = vmatpush1.msra.mxu1 %v1463_v8 }
 0x366   :  { %563 = vmatprep.subr.mxu1 %v1377_v0 }
 0x367   :  { %564 = vmatpush1.msra.mxu1 %v1467_v9 }
 0x368   :  { %565 = vmatprep.subr.mxu1 %v1377_v0 }
 0x369   :  { %566 = vmatpush1.msra.mxu1 %v1490_v15 }
 0x36a   :  { %567 = vmatprep.subr.mxu1 %v1377_v0 }
 0x36b   :  { %568 = vmatpush1.msra.mxu1 %v1499_v17 }
 0x36c   :  { %569 = vmatprep.subr.mxu1 %v1377_v0 }
 0x36d   :  { %570 = vmatpush1.msra.mxu1 %v1508_v19 }
 0x36e   :  { %571 = vmatprep.subr.mxu1 %v1377_v0 }
 0x36f   :  { %572 = vmatpush1.msra.mxu1 %v1514_v20 }
 0x370   :  { %573 = vmatprep.subr.mxu1 %v1377_v0 }
 0x371   :  { %574 = vmatpush1.msra.mxu1 %v1520_v21 }
 0x372   :  { %575 = vmatprep.subr.mxu1 %v1377_v0 }
 0x373   :  { %576 = vmatpush1.msra.mxu1 %v1526_v22 }
 0x374   :  { %577 = vmatprep.subr.mxu1 %v1377_v0 }
 0x375   :  { %578 = vmatpush1.msra.mxu1 %v1532_v23 }
 0x376   :  { %579 = vmatprep.subr.mxu1 %v1377_v0 }
 0x377   :  { %580 = vmatpush1.msra.mxu1 %v1538_v24 }
 0x378   :  { %581 = vmatprep.subr.mxu1 %v1377_v0 }
 0x379   :  { %582 = vmatpush1.msra.mxu1 %v1544_v25 }
 0x37a   :  { %583 = vmatprep.subr.mxu1 %v1377_v0 }
 0x37b   :  { %584 = vmatpush1.msra.mxu1 %v1550_v26 }
 0x37c   :  { %601 = vmatprep.subr.mxu1 %v1377_v0 }
 0x37d   :  { %602 = vmatpush2.msra.mxu1 %v1556_v27 }
 0x37e   :  { %603 = vmatprep.subr.mxu1 %v1377_v0 }
 0x37f   :  { %604 = vmatpush2.msra.mxu1 %v1562_v28 }
 0x380   :  { %605 = vmatprep.subr.mxu1 %v1377_v0 }
 0x381   :  { %606 = vmatpush2.msra.mxu1 %v1568_v29 }
 0x382   :  { %607 = vmatprep.subr.mxu1 %v1377_v0 }
 0x383   :  { %608 = vmatpush2.msra.mxu1 %v1574_v30 }
 0x384   :  { %609 = vmatprep.subr.mxu1 %v1377_v0 }
 0x385   :  { %610 = vmatpush2.msra.mxu1 %v1580_v31 }
 0x386   :  { %611 = vmatprep.subr.mxu1 %v1377_v0 }
 0x387   :  { %612 = vmatpush2.msra.mxu1 %v1586_v32 }
 0x388   :  { %613 = vmatprep.subr.mxu1 %v1377_v0 }
 0x389   :  { %614 = vmatpush2.msra.mxu1 %v1592_v33 }
 0x38a   :  { %615 = vmatprep.subr.mxu1 %v1377_v0 }
 0x38b   :  { %616 = vmatpush2.msra.mxu1 %v1598_v34 }
 0x38c   :  { %815 = vmatprep.subr.mxu1 %v1377_v0 }
 0x41c   :  { %v336_v50 = vpop.f32.mrf.mxu1 }
 0x41d   :  { %v337_v42 = vadd.f32 %v336_v50, %v1713_v10 }
 0x41e   :  { %v338_v44 = vpop.f32.mrf.mxu1 }
 0x41f   :  { %v340_v46 = vmul.f32 %v337_v42, %v1716_v16  ;;  %v397_v42 = vrot.slane %v1377_v0, 2 }
 0x421   :  { %v1261_v47 = vmul.f32 -1.442695, %v340_v46 }
 0x423   :  { %1293 = vpow2.f32 %v1261_v47 }
 0x430   :  { %v1294_v48 = vpop.eup %1293 }
 0x431   :  { %v344_v49 = vadd.f32 1.0, %v1294_v48 }
 0x433   :  { %1295 = vrcp.f32 %v344_v49 }
 0x440   :  { %v1296_v51 = vpop.eup %1295 }
 0x441   :  { %v347_v52 = vmul.f32 2.0, %v1296_v51 }
 0x443   :  { %v1262_v53 = vadd.f32 -1.0, %v347_v52 }
 0x445   :  { %359 = vrot.lane.b32.xlu0 %v1262_v53, %s1378_s12 }
 0x449   :  { %352 = vrot.lane.b32.xlu0 %v215_v14, %s1379_s13 }
 0x4b7   :  { %v360_v54 = vpop.permute.xlu0 %359 }
 0x4b8   :  { %v362_v57 = vmul.f32 %v1296_v51, %v360_v54 }
 0x4ba   :  { %364 = vrot.lane.b32.xlu1 %v362_v57, %s1379_s13 }
 0x4bb   :  { %v1796_v59 = vpop.permute.xlu0 %352 }
 0x4bc   :  { %v356_v61 = vsel %vm122_vm1, %v355_v60, %v1796_v59 }
 0x4bd   :  { %v357_v63 = vmul.f32 %v1296_v51, %v356_v61 }
 0x52c   :  { %v365_v1 = vpop.permute.xlu1 %364 }
 0x52d   :  { %v1802_v5 = vadd.f32 %v365_v1, %v357_v63 }
 0x52f   :  { %1297 = vtanh.f32 %v1802_v5 }
 0x53c   :  { %v1298_v12 = vpop.eup %1297 }
 0x53d   :  { %370 = vrot.lane.b32.xlu0 %v1298_v12, %s1378_s12 }
 0x5af   :  { %v371_v14 = vpop.permute.xlu0 %370 }
 0x5b0   :  { %v373_v18 = vmul.f32 %v1296_v51, %v371_v14  ;;  %v407_v51 = vsel %vm119_vm0, %v397_v42, %v1617_v38  ;;  %v1382_v42 = vmov 1966171168  }
 0x5b2   :  { %384 = vrot.lane.b32.xlu0 %v373_v18, %s1380_s15  ;;  %v378_v35 = vrot.slane %v373_v18, 6  ;;  %v387_v55 = vrot.slane %v373_v18, 2 }
 0x5b4   :  { %379 = vrot.lane.b32.xlu1 %v378_v35, %s1378_s12 }
 0x5b8   :  { %391 = vrot.lane.b32.xlu1 %v387_v55, %s1379_s13 }
 0x624   :  { %v385_v36 = vpop.permute.xlu0 %384 }
 0x625   :  { %v389_v39 = vsel %vm62_vm5, 0.0, %v385_v36 }
 0x626   :  { %v380_v11 = vpop.permute.xlu1 %379  ;;  %v390_v13 = vsel %vm64_vm6, %v389_v39, %v387_v55 }
 0x627   :  { %v382_v50 = vsel %vm91_vm3, %v375_v37, %v380_v11  ;;  %v401_v47 = vrot.slane %v390_v13, 6  ;;  %v492_v37 = vsel %vm122_vm1, %v1802_v5, %v1796_v59 }
 0x628   :  { %v383_v44 = vsel %vm62_vm5, %v382_v50, 0.0 }
 0x629   :  { %v396_v46 = vrot.slane %v383_v44, 2  ;;  %v1035_v44 = vunpack.c.l.s4 %v1382_v42 }
 0x62a   :  { %v392_v48 = vpop.permute.xlu1 %391 }
 0x62b   :  { %v394_v49 = vsel %vm91_vm3, %v392_v48, %v1624_v43  ;;  %v406_v53 = vsel %vm119_vm0, %v396_v46, %v401_v47  ;;  %v1036_v46 = vunpack.c.0.s8 %v1035_v44 }
 0x62c   :  { %v404_v52 = vrot.slane %v394_v49, 4  ;;  %v408_v57 = vsel %vm122_vm1, %v406_v53, %v1649_v56 }
 0x62d   :  { %v1885_v48 = vsub.s32 %v1036_v46, %v1703_v62 }
 0x62e   :  { %v409_v54 = vsel %vm122_vm1, %v407_v51, %v404_v52 }
 0x62f   :  { %1263 = vmatprep.mubr.msk.f32.mxu0 %vm62_vm5, %v409_v54 }
 0x630   :  { %478 = vmatmul.mubr.f32.vlgmr.msra.gmra.mxu0 %v408_v57 }
 0x631   :  { %687 = vmatpush1.msra.mxu0 %v1436_v3 }
 0x632   :  { %688 = vmatprep.subr.mxu0 %v1377_v0 }
 0x633   :  { %689 = vmatpush1.msra.mxu0 %v1438_v4 }
 0x634   :  { %690 = vmatprep.subr.mxu0 %v1377_v0 }
 0x635   :  { %691 = vmatpush1.msra.mxu0 %v1450_v6 }
 0x636   :  { %692 = vmatprep.subr.mxu0 %v1377_v0 }
 0x637   :  { %693 = vmatpush1.msra.mxu0 %v1457_v7 }
 0x638   :  { %694 = vmatprep.subr.mxu0 %v1377_v0 }
 0x639   :  { %695 = vmatpush1.msra.mxu0 %v1463_v8 }
 0x63a   :  { %696 = vmatprep.subr.mxu0 %v1377_v0 }
 0x63b   :  { %697 = vmatpush1.msra.mxu0 %v1467_v9 }
 0x63c   :  { %698 = vmatprep.subr.mxu0 %v1377_v0 }
 0x63d   :  { %699 = vmatpush1.msra.mxu0 %v1490_v15 }
 0x63e   :  { %700 = vmatprep.subr.mxu0 %v1377_v0 }
 0x63f   :  { %701 = vmatpush1.msra.mxu0 %v1499_v17 }
 0x640   :  { %702 = vmatprep.subr.mxu0 %v1377_v0 }
 0x641   :  { %703 = vmatpush1.msra.mxu0 %v1508_v19 }
 0x642   :  { %704 = vmatprep.subr.mxu0 %v1377_v0 }
 0x643   :  { %705 = vmatpush1.msra.mxu0 %v1514_v20 }
 0x644   :  { %706 = vmatprep.subr.mxu0 %v1377_v0 }
 0x645   :  { %707 = vmatpush1.msra.mxu0 %v1520_v21 }
 0x646   :  { %708 = vmatprep.subr.mxu0 %v1377_v0 }
 0x647   :  { %709 = vmatpush1.msra.mxu0 %v1526_v22 }
 0x648   :  { %710 = vmatprep.subr.mxu0 %v1377_v0 }
 0x649   :  { %711 = vmatpush1.msra.mxu0 %v1532_v23 }
 0x64a   :  { %712 = vmatprep.subr.mxu0 %v1377_v0 }
 0x64b   :  { %713 = vmatpush1.msra.mxu0 %v1538_v24 }
 0x64c   :  { %714 = vmatprep.subr.mxu0 %v1377_v0 }
 0x64d   :  { %715 = vmatpush1.msra.mxu0 %v1544_v25 }
 0x64e   :  { %716 = vmatprep.subr.mxu0 %v1377_v0 }
 0x64f   :  { %717 = vmatpush1.msra.mxu0 %v1550_v26 }
 0x650   :  { %734 = vmatprep.subr.mxu0 %v1377_v0 }
 0x651   :  { %735 = vmatpush2.msra.mxu0 %v1556_v27 }
 0x652   :  { %736 = vmatprep.subr.mxu0 %v1377_v0 }
 0x653   :  { %737 = vmatpush2.msra.mxu0 %v1562_v28 }
 0x654   :  { %738 = vmatprep.subr.mxu0 %v1377_v0 }
 0x655   :  { %739 = vmatpush2.msra.mxu0 %v1568_v29 }
 0x656   :  { %740 = vmatprep.subr.mxu0 %v1377_v0 }
 0x657   :  { %741 = vmatpush2.msra.mxu0 %v1574_v30 }
 0x658   :  { %742 = vmatprep.subr.mxu0 %v1377_v0 }
 0x659   :  { %743 = vmatpush2.msra.mxu0 %v1580_v31 }
 0x65a   :  { %744 = vmatprep.subr.mxu0 %v1377_v0 }
 0x65b   :  { %745 = vmatpush2.msra.mxu0 %v1586_v32 }
 0x65c   :  { %746 = vmatprep.subr.mxu0 %v1377_v0 }
 0x65d   :  { %747 = vmatpush2.msra.mxu0 %v1592_v33 }
 0x65e   :  { %748 = vmatprep.subr.mxu0 %v1377_v0 }
 0x65f   :  { %749 = vmatpush2.msra.mxu0 %v1598_v34 }
 0x660   :  { %935 = vmatprep.subr.mxu0 %v1377_v0 }
 0x6f0   :  { %v479_v43 = vpop.f32.mrf.mxu0 }
 0x6f1   :  { %v480_v58 = vadd.f32 %v479_v43, %v1713_v10 }
 0x6f2   :  { %v481_v60 = vpop.f32.mrf.mxu0 }
 0x6f3   :  { %v483_v61 = vmul.f32 %v480_v58, %v1716_v16  ;;  %v511_v58 = vsel %vm510_vm9, %v1620_v40, %v1622_v41 }
 0x6f5   :  { %v1264_v63 = vmul.f32 -1.442695, %v483_v61 }
 0x6f7   :  { %1299 = vpow2.f32 %v1264_v63 }
 0x704   :  { %v1300_v1 = vpop.eup %1299 }
 0x705   :  { %v487_v12 = vadd.f32 1.0, %v1300_v1 }
 0x707   :  { %1301 = vrcp.f32 %v487_v12  ;;  %v537_v12 = vrot.slane %v1377_v0, 3 }
 0x714   :  { %v1302_v14 = vpop.eup %1301 }
 0x715   :  { %v490_v18 = vmul.f32 2.0, %v1302_v14  ;;  %v493_v39 = vmul.f32 %v1302_v14, %v492_v37 }
 0x717   :  { %v1265_v35 = vadd.f32 -1.0, %v490_v18 }
 0x719   :  { %495 = vrot.lane.b32.xlu0 %v1265_v35, %s1378_s12 }
 0x78b   :  { %v496_v55 = vpop.permute.xlu0 %495 }
 0x78c   :  { %v498_v36 = vmul.f32 %v1302_v14, %v496_v55 }
 0x78e   :  { %500 = vrot.lane.b32.xlu1 %v498_v36, %s1379_s13 }
 0x800   :  { %v501_v11 = vpop.permute.xlu1 %500 }
 0x801   :  { %v1880_v13 = vadd.f32 %v501_v11, %v493_v39  ;;  %v547_v39 = vsel %vm119_vm0, %v537_v12, %v1617_v38  ;;  %v680_v12 = vsel %vm119_vm0, %v1649_v56, %v1617_v38  ;;  %v1331_v38 = vld [vmem:[#allocation2 + $0x68] sm:$0xff] }
 0x803   :  { %1303 = vtanh.f32 %v1880_v13 }
 0x810   :  { %v1304_v50 = vpop.eup %1303 }
 0x811   :  { %506 = vrot.lane.b32.xlu0 %v1304_v50, %s1378_s12 }
 0x883   :  { %v507_v47 = vpop.permute.xlu0 %506 }
 0x884   :  { %v509_v49 = vmul.f32 %v1302_v14, %v507_v47 }
 0x886   :  { %v1033_v51 = vcombine.high %v509_v49, %v509_v49  ;;  %520 = vrot.lane.b32.xlu0 %v509_v49, %s1380_s15  ;;  %v514_v59 = vrot.slane %v509_v49, 5  ;;  %v530_v5 = vrot.slane %v509_v49, 4  ;;  %v523_v53 = vrot.slane %v509_v49, 2 }
 0x888   :  { %515 = vrot.lane.b32.xlu1 %v514_v59, %s1378_s12  ;;  %v1890_v52 = vrot.slane %v1033_v51, %v1885_v48 }
 0x88a   :  { %531 = vrot.lane.b32.xlu0 %v530_v5, %s1378_s12  ;;  %v1048_v54 = vrot.slane %v1890_v52, %v1885_v48  ;;  %v1041_v62 = vcombine.high %v1890_v52, %v1890_v52 }
 0x88c   :  { %527 = vrot.lane.b32.xlu1 %v523_v53, %s1379_s13  ;;  %v1899_v57 = vrot.slane %v1041_v62, %v1885_v48  ;;  %v650_v62 = vsel %vm649_vm11, %v1620_v40, %v1622_v41 }
 0x8f8   :  { %v521_v43 = vpop.permute.xlu0 %520 }
 0x8f9   :  { %v525_v60 = vsel %vm62_vm5, 0.0, %v521_v43 }
 0x8fa   :  { %v516_v61 = vpop.permute.xlu1 %515  ;;  %v526_v63 = vsel %vm64_vm6, %v525_v60, %v523_v53 }
 0x8fb   :  { %v518_v1 = vsel %vm91_vm3, %v511_v58, %v516_v61  ;;  %v541_v35 = vrot.slane %v526_v63, 6 }
 0x8fc   :  { %v519_v14 = vsel %vm62_vm5, %v518_v1, 0.0  ;;  %v532_v55 = vpop.permute.xlu0 %531 }
 0x8fd   :  { %v536_v18 = vrot.slane %v519_v14, 3 }
 0x8fe   :  { %v528_v36 = vpop.permute.xlu1 %527 }
 0x8ff   :  { %v534_v37 = vsel %vm91_vm3, %v528_v36, %v532_v55  ;;  %v546_v50 = vsel %vm119_vm0, %v536_v18, %v541_v35  ;;  %v1329_v35 = vld [vmem:[#allocation2 + $0x78] sm:$0xff]  ;;  %v1330_v55 = vld [vmem:[#allocation2 + $0x70] sm:$0xff]  ;;  %v1332_v36 = vld [vmem:[#allocation2 + $0x60] sm:$0xff] }
 0x900   :  { %v544_v11 = vrot.slane %v534_v37, 4  ;;  %v548_v44 = vsel %vm122_vm1, %v546_v50, %v1649_v56  ;;  %v1333_v37 = vld [vmem:[#allocation2 + $0x58] sm:$0xff]  ;;  %v1336_v50 = vld [vmem:[#allocation2 + $0x40] sm:$0xff] }
 0x902   :  { %v549_v42 = vsel %vm122_vm1, %v547_v39, %v544_v11  ;;  %v1334_v39 = vld [vmem:[#allocation2 + $0x50] sm:$0xff]  ;;  %v1335_v11 = vld [vmem:[#allocation2 + $0x48] sm:$0xff] }
 0x903   :  { %1266 = vmatprep.mubr.msk.f32.mxu1 %vm62_vm5, %v549_v42  ;;  %v1337_v42 = vld [vmem:[#allocation2 + $0x38] sm:$0xff] }
 0x904   :  { %618 = vmatmul.mubr.f32.vlgmr.msra.gmra.mxu1 %v548_v44  ;;  %v1338_v44 = vld [vmem:[#allocation2 + $0x30] sm:$0xff] }
 0x905   :  { %816 = vmatpush1.msra.mxu1 %v1436_v3 }
 0x906   :  { %817 = vmatprep.subr.mxu1 %v1377_v0 }
 0x907   :  { %818 = vmatpush1.msra.mxu1 %v1438_v4 }
 0x908   :  { %819 = vmatprep.subr.mxu1 %v1377_v0 }
 0x909   :  { %820 = vmatpush1.msra.mxu1 %v1450_v6 }
 0x90a   :  { %821 = vmatprep.subr.mxu1 %v1377_v0 }
 0x90b   :  { %822 = vmatpush1.msra.mxu1 %v1457_v7 }
 0x90c   :  { %823 = vmatprep.subr.mxu1 %v1377_v0 }
 0x90d   :  { %824 = vmatpush1.msra.mxu1 %v1463_v8 }
 0x90e   :  { %825 = vmatprep.subr.mxu1 %v1377_v0 }
 0x90f   :  { %826 = vmatpush1.msra.mxu1 %v1467_v9 }
 0x910   :  { %827 = vmatprep.subr.mxu1 %v1377_v0 }
 0x911   :  { %828 = vmatpush1.msra.mxu1 %v1490_v15 }
 0x912   :  { %829 = vmatprep.subr.mxu1 %v1377_v0 }
 0x913   :  { %830 = vmatpush1.msra.mxu1 %v1499_v17 }
 0x914   :  { %831 = vmatprep.subr.mxu1 %v1377_v0 }
 0x915   :  { %832 = vmatpush1.msra.mxu1 %v1508_v19 }
 0x916   :  { %833 = vmatprep.subr.mxu1 %v1377_v0 }
 0x917   :  { %834 = vmatpush1.msra.mxu1 %v1514_v20 }
 0x918   :  { %835 = vmatprep.subr.mxu1 %v1377_v0 }
 0x919   :  { %836 = vmatpush1.msra.mxu1 %v1520_v21 }
 0x91a   :  { %837 = vmatprep.subr.mxu1 %v1377_v0 }
 0x91b   :  { %838 = vmatpush1.msra.mxu1 %v1526_v22 }
 0x91c   :  { %839 = vmatprep.subr.mxu1 %v1377_v0 }
 0x91d   :  { %840 = vmatpush1.msra.mxu1 %v1532_v23 }
 0x91e   :  { %841 = vmatprep.subr.mxu1 %v1377_v0 }
 0x91f   :  { %842 = vmatpush1.msra.mxu1 %v1538_v24 }
 0x920   :  { %843 = vmatprep.subr.mxu1 %v1377_v0 }
 0x921   :  { %844 = vmatpush1.msra.mxu1 %v1544_v25 }
 0x922   :  { %845 = vmatprep.subr.mxu1 %v1377_v0 }
 0x923   :  { %846 = vmatpush1.msra.mxu1 %v1550_v26 }
 0x924   :  { %863 = vmatprep.subr.mxu1 %v1377_v0 }
 0x925   :  { %864 = vmatpush2.msra.mxu1 %v1556_v27 }
 0x926   :  { %865 = vmatprep.subr.mxu1 %v1377_v0 }
 0x927   :  { %866 = vmatpush2.msra.mxu1 %v1562_v28 }
 0x928   :  { %867 = vmatprep.subr.mxu1 %v1377_v0 }
 0x929   :  { %868 = vmatpush2.msra.mxu1 %v1568_v29 }
 0x92a   :  { %869 = vmatprep.subr.mxu1 %v1377_v0 }
 0x92b   :  { %870 = vmatpush2.msra.mxu1 %v1574_v30 }
 0x92c   :  { %871 = vmatprep.subr.mxu1 %v1377_v0 }
 0x92d   :  { %872 = vmatpush2.msra.mxu1 %v1580_v31 }
 0x92e   :  { %873 = vmatprep.subr.mxu1 %v1377_v0 }
 0x92f   :  { %874 = vmatpush2.msra.mxu1 %v1586_v32 }
 0x930   :  { %875 = vmatprep.subr.mxu1 %v1377_v0 }
 0x931   :  { %876 = vmatpush2.msra.mxu1 %v1592_v33 }
 0x932   :  { %877 = vmatprep.subr.mxu1 %v1377_v0 }
 0x933   :  { %878 = vmatpush2.msra.mxu1 %v1598_v34 }
 0x9c4   :  { %v619_v3 = vpop.f32.mrf.mxu1 }
 0x9c5   :  { %v620_v4 = vadd.f32 %v619_v3, %v1713_v10  ;;  %v1339_v3 = vld [vmem:[#allocation2 + $0x28] sm:$0xff] }
 0x9c6   :  { %v621_v6 = vpop.f32.mrf.mxu1 }
 0x9c7   :  { %v623_v7 = vmul.f32 %v620_v4, %v1716_v16  ;;  %v1340_v4 = vld [vmem:[#allocation2 + $0x20] sm:$0xff]  ;;  %v1341_v6 = vld [vmem:[#allocation2 + $0x18] sm:$0xff] }
 0x9c9   :  { %v1267_v8 = vmul.f32 -1.442695, %v623_v7  ;;  %v1342_v7 = vld [vmem:[#allocation2 + $0x10] sm:$0xff] }
 0x9cb   :  { %1305 = vpow2.f32 %v1267_v8  ;;  %v1343_v8 = vld [vmem:[#allocation2 + $0x8] sm:$0xff] }
 0x9d8   :  { %v1306_v9 = vpop.eup %1305 }
 0x9d9   :  { %v627_v15 = vadd.f32 1.0, %v1306_v9  ;;  %v1344_v9 = vld [vmem:[#allocation2] sm:$0xff] }
 0x9db   :  { %1307 = vrcp.f32 %v627_v15  ;;  %v1345_v15 = vld [vmem:[#allocation2 + $0xb8] sm:$0xff] }
 0x9e8   :  { %v1308_v17 = vpop.eup %1307 }
 0x9e9   :  { %v630_v19 = vmul.f32 2.0, %v1308_v17  ;;  %v632_v23 = vmul.f32 %v1308_v17, %v1880_v13 }
 0x9eb   :  { %v1268_v20 = vadd.f32 -1.0, %v630_v19  ;;  %v1347_v19 = vld [vmem:[#allocation2 + $0xa8] sm:$0xff] }
 0x9ed   :  { %634 = vrot.lane.b32.xlu1 %v1268_v20, %s1378_s12  ;;  %v1348_v20 = vld [vmem:[#allocation2 + $0xa0] sm:$0xff] }
 0xa5f   :  { %v635_v21 = vpop.permute.xlu1 %634 }
 0xa60   :  { %v637_v22 = vmul.f32 %v1308_v17, %v635_v21  ;;  %v1349_v21 = vld [vmem:[#allocation2 + $0x98] sm:$0xff] }
 0xa62   :  { %639 = vrot.lane.b32.xlu0 %v637_v22, %s1379_s13  ;;  %v1350_v22 = vld [vmem:[#allocation2 + $0x90] sm:$0xff] }
 0xad4   :  { %v640_v24 = vpop.permute.xlu0 %639 }
 0xad5   :  { %v1968_v25 = vadd.f32 %v640_v24, %v632_v23 }
 0xad7   :  { %1309 = vtanh.f32 %v1968_v25 }
 0xae4   :  { %v1310_v26 = vpop.eup %1309 }
 0xae5   :  { %645 = vrot.lane.b32.xlu1 %v1310_v26, %s1378_s12 }
 0xb57   :  { %v646_v27 = vpop.permute.xlu1 %645 }
 0xb58   :  { %v648_v28 = vmul.f32 %v1308_v17, %v646_v27  ;;  %v1346_v17 = vld [vmem:[#allocation2 + $0xb0] sm:$0xff] }
 0xb5a   :  { %v1058_v29 = vcombine.high %v648_v28, %v648_v28  ;;  %659 = vrot.lane.b32.xlu1 %v648_v28, %s1380_s15  ;;  %v653_v30 = vrot.slane %v648_v28, 4  ;;  %v662_v46 = vrot.slane %v648_v28, 2 }
 0xb5c   :  { %v1065_v31 = vrot.slane %v1058_v29, %v1885_v48  ;;  %654 = vrot.lane.b32.xlu0 %v653_v30, %s1378_s12 }
 0xb5e   :  { %v1066_v32 = vcombine.high %v1065_v31, %v1065_v31  ;;  %v1073_v13 = vrot.slane %v1065_v31, %v1885_v48 }
 0xb60   :  { %v1080_v47 = vrot.slane %v1066_v32, %v1885_v48  ;;  %666 = vrot.lane.b32.xlu0 %v662_v46, %s1379_s13  ;;  %v1154_v49 = vrot.slane %v1073_v13, %v1707_v2 }
 0xb62   :  { %v1982_v51 = vsel %vm1191_vm10, %v1048_v54, %v1154_v49  ;;  %v1158_v59 = vrot.slane %v1080_v47, %v1707_v2 }
 0xb64   :  { %v1986_v5 = vsel %vm1191_vm10, %v1899_v57, %v1158_v59 }
 0xbcc   :  { %v660_v53 = vpop.permute.xlu1 %659 }
 0xbcd   :  { %v664_v43 = vsel %vm62_vm5, 0.0, %v660_v53 }
 0xbce   :  { %v655_v58 = vpop.permute.xlu0 %654  ;;  %v665_v60 = vsel %vm64_vm6, %v664_v43, %v662_v46 }
 0xbcf   :  { %v657_v61 = vsel %vm91_vm3, %v650_v62, %v655_v58  ;;  %v674_v63 = vrot.slane %v665_v60, 6 }
 0xbd0   :  { %v658_v52 = vsel %vm62_vm5, %v657_v61, 0.0 }
 0xbd1   :  { %v671_v54 = vrot.slane %v658_v52, 4 }
 0xbd2   :  { %v667_v1 = vpop.permute.xlu0 %666 }
 0xbd3   :  { %v669_v57 = vsel %vm91_vm3, %v667_v1, %v655_v58  ;;  %v679_v40 = vsel %vm119_vm0, %v671_v54, %v674_v63 }
 0xbd4   :  { %v677_v14 = vrot.slane %v669_v57, 4  ;;  %v681_v18 = vsel %vm122_vm1, %v679_v40, %v1649_v56 }
 0xbd6   :  { %v682_v41 = vsel %vm122_vm1, %v680_v12, %v677_v14 }
 0xbd7   :  { %1269 = vmatprep.mubr.msk.f32.mxu0 %vm62_vm5, %v682_v41 }
 0xbd8   :  { %751 = vmatmul.mubr.f32.vlgmr.msra.gmra.mxu0 %v681_v18 }
 0xbd9   :  { %936 = vmatpush1.msra.mxu0 %v1329_v35 }
 0xbda   :  { %937 = vmatprep.subr.mxu0 %v1377_v0 }
 0xbdb   :  { %938 = vmatpush1.msra.mxu0 %v1330_v55 }
 0xbdc   :  { %939 = vmatprep.subr.mxu0 %v1377_v0 }
 0xbdd   :  { %940 = vmatpush1.msra.mxu0 %v1331_v38 }
 0xbde   :  { %941 = vmatprep.subr.mxu0 %v1377_v0 }
 0xbdf   :  { %942 = vmatpush1.msra.mxu0 %v1332_v36 }
 0xbe0   :  { %943 = vmatprep.subr.mxu0 %v1377_v0 }
 0xbe1   :  { %944 = vmatpush1.msra.mxu0 %v1333_v37 }
 0xbe2   :  { %945 = vmatprep.subr.mxu0 %v1377_v0 }
 0xbe3   :  { %946 = vmatpush1.msra.mxu0 %v1334_v39 }
 0xbe4   :  { %947 = vmatprep.subr.mxu0 %v1377_v0 }
 0xbe5   :  { %948 = vmatpush1.msra.mxu0 %v1335_v11 }
 0xbe6   :  { %949 = vmatprep.subr.mxu0 %v1377_v0 }
 0xbe7   :  { %950 = vmatpush1.msra.mxu0 %v1336_v50 }
 0xbe8   :  { %951 = vmatprep.subr.mxu0 %v1377_v0 }
 0xbe9   :  { %952 = vmatpush1.msra.mxu0 %v1337_v42 }
 0xbea   :  { %953 = vmatprep.subr.mxu0 %v1377_v0 }
 0xbeb   :  { %954 = vmatpush1.msra.mxu0 %v1338_v44 }
 0xbec   :  { %955 = vmatprep.subr.mxu0 %v1377_v0 }
 0xbed   :  { %956 = vmatpush1.msra.mxu0 %v1339_v3 }
 0xbee   :  { %957 = vmatprep.subr.mxu0 %v1377_v0 }
 0xbef   :  { %958 = vmatpush1.msra.mxu0 %v1340_v4 }
 0xbf0   :  { %959 = vmatprep.subr.mxu0 %v1377_v0 }
 0xbf1   :  { %960 = vmatpush1.msra.mxu0 %v1341_v6 }
 0xbf2   :  { %961 = vmatprep.subr.mxu0 %v1377_v0 }
 0xbf3   :  { %962 = vmatpush1.msra.mxu0 %v1342_v7 }
 0xbf4   :  { %963 = vmatprep.subr.mxu0 %v1377_v0 }
 0xbf5   :  { %964 = vmatpush1.msra.mxu0 %v1343_v8 }
 0xbf6   :  { %965 = vmatprep.subr.mxu0 %v1377_v0 }
 0xbf7   :  { %966 = vmatpush1.msra.mxu0 %v1344_v9 }
 0xbf8   :  { %983 = vmatprep.subr.mxu0 %v1377_v0 }
 0xbf9   :  { %984 = vmatpush2.msra.mxu0 %v1345_v15 }
 0xbfa   :  { %985 = vmatprep.subr.mxu0 %v1377_v0 }
 0xbfb   :  { %986 = vmatpush2.msra.mxu0 %v1346_v17 }
 0xbfc   :  { %987 = vmatprep.subr.mxu0 %v1377_v0 }
 0xbfd   :  { %988 = vmatpush2.msra.mxu0 %v1347_v19 }
 0xbfe   :  { %989 = vmatprep.subr.mxu0 %v1377_v0 }
 0xbff   :  { %990 = vmatpush2.msra.mxu0 %v1348_v20 }
 0xc00   :  { %991 = vmatprep.subr.mxu0 %v1377_v0 }
 0xc01   :  { %992 = vmatpush2.msra.mxu0 %v1349_v21 }
 0xc02   :  { %993 = vmatprep.subr.mxu0 %v1377_v0 }
 0xc03   :  { %994 = vmatpush2.msra.mxu0 %v1350_v22 }
 0xc04   :  { %995 = vmatprep.subr.mxu0 %v1377_v0 }
 0xc05   :  { %996 = vmatpush2.msra.mxu0 %v1592_v33 }
 0xc06   :  { %997 = vmatprep.subr.mxu0 %v1377_v0 }
 0xc07   :  { %998 = vmatpush2.msra.mxu0 %v1598_v34 }
 0xc98   :  { %v752_v23 = vpop.f32.mrf.mxu0 }
 0xc99   :  { %v753_v24 = vadd.f32 %v752_v23, %v1713_v10 }
 0xc9a   :  { %v754_v26 = vpop.f32.mrf.mxu0 }
 0xc9b   :  { %v756_v27 = vmul.f32 %v753_v24, %v1716_v16 }
 0xc9d   :  { %v1270_v28 = vmul.f32 -1.442695, %v756_v27 }
 0xc9f   :  { %1311 = vpow2.f32 %v1270_v28 }
 0xcac   :  { %v1312_v29 = vpop.eup %1311 }
 0xcad   :  { %v760_v30 = vadd.f32 1.0, %v1312_v29 }
 0xcaf   :  { %1313 = vrcp.f32 %v760_v30 }
 0xcbc   :  { %v1314_v31 = vpop.eup %1313 }
 0xcbd   :  { %v763_v32 = vmul.f32 2.0, %v1314_v31  ;;  %v765_v34 = vmul.f32 %v1314_v31, %v1968_v25 }
 0xcbf   :  { %v1271_v13 = vadd.f32 -1.0, %v763_v32 }
 0xcc1   :  { %767 = vrot.lane.b32.xlu1 %v1271_v13, %s1378_s12 }
 0xd33   :  { %v768_v33 = vpop.permute.xlu1 %767 }
 0xd34   :  { %v770_v0 = vmul.f32 %v1314_v31, %v768_v33 }
 0xd36   :  { %772 = vrot.lane.b32.xlu0 %v770_v0, %s1379_s13 }
 0xda8   :  { %v773_v46 = vpop.permute.xlu0 %772 }
 0xda9   :  { %v2033_v47 = vadd.f32 %v773_v46, %v765_v34 }
 0xdab   :  { %1315 = vtanh.f32 %v2033_v47 }
 0xdb8   :  { %v1316_v49 = vpop.eup %1315 }
 0xdb9   :  { %778 = vrot.lane.b32.xlu1 %v1316_v49, %s1378_s12 }
 0xe2b   :  { %v779_v59 = vpop.permute.xlu1 %778 }
 0xe2c   :  { %v2037_v53 = vmul.f32 %v1314_v31, %v779_v59 }
 0xe2e   :  { %788 = vrot.lane.b32.xlu0 %v2037_v53, %s1380_s15  ;;  %v791_v62 = vrot.slane %v2037_v53, 2  ;;  %v1081_v43 = vcombine.high %v2037_v53, %v2037_v53  ;;  %v798_v25 = vrot.slane %v2037_v53, 4 }
 0xe30   :  { %795 = vrot.lane.b32.xlu1 %v791_v62, %s1379_s13  ;;  %v1088_v58 = vrot.slane %v1081_v43, %v1885_v48 }
 0xe32   :  { %799 = vrot.lane.b32.xlu0 %v798_v25, %s1378_s12  ;;  %v1096_v60 = vrot.slane %v1088_v58, %v1885_v48  ;;  %v1089_v61 = vcombine.high %v1088_v58, %v1088_v58 }
 0xe34   :  { %783 = vrot.lane.b32.xlu1 %v2037_v53, %s1378_s12  ;;  %v1164_v52 = vrot.slane %v1096_v60, %v1707_v2  ;;  %v1103_v54 = vrot.slane %v1089_v61, %v1885_v48 }
 0xe36   :  { %v1194_v63 = vsel %vm119_vm0, %v1982_v51, %v1164_v52  ;;  %v1168_v1 = vrot.slane %v1103_v54, %v1707_v2  ;;  %v1351_v54 = vld [vmem:[%s2154_s2] sm:$0x3f] }
 0xe38   :  { %v1195_v57 = vsel %vm119_vm0, %v1986_v5, %v1168_v1 }
 0xea0   :  { %v789_v12 = vpop.permute.xlu0 %788 }
 0xea1   :  { %v793_v14 = vsel %vm62_vm5, 0.0, %v789_v12 }
 0xea2   :  { %v796_v40 = vpop.permute.xlu1 %795  ;;  %v794_v41 = vsel %vm64_vm6, %v793_v14, %v791_v62 }
 0xea3   :  { %v804_v36 = vrot.slane %v794_v41, 6 }
 0xea4   :  { %v800_v18 = vpop.permute.xlu0 %799 }
 0xea5   :  { %v802_v35 = vsel %vm91_vm3, %v796_v40, %v800_v18 }
 0xea6   :  { %v807_v55 = vrot.slane %v802_v35, 4  ;;  %v784_v38 = vpop.permute.xlu1 %783 }
 0xea7   :  { %v786_v37 = vsel %vm91_vm3, 0.0, %v784_v38 }
 0xea8   :  { %v787_v51 = vsel %vm62_vm5, %v786_v37, 0.0  ;;  %v811_v39 = vsel %vm122_vm1, %v1631_v45, %v807_v55 }
 0xea9   :  { %v809_v5 = vsel %vm119_vm0, %v787_v51, %v804_v36  ;;  %1272 = vmatprep.mubr.msk.f32.mxu1 %vm62_vm5, %v811_v39 }
 0xeaa   :  { %v810_v11 = vsel %vm122_vm1, %v809_v5, %v1649_v56 }
 0xeab   :  { %880 = vmatmul.mubr.f32.vlgmr.msra.gmra.mxu1 %v810_v11 }
 0xf6b   :  { %v881_v50 = vpop.f32.mrf.mxu1 }
 0xf6c   :  { %v882_v42 = vadd.f32 %v881_v50, %v1713_v10 }
 0xf6d   :  { %v883_v44 = vpop.f32.mrf.mxu1 }
 0xf6e   :  { %v885_v3 = vmul.f32 %v882_v42, %v1716_v16 }
 0xf70   :  { %v1273_v4 = vmul.f32 -1.442695, %v885_v3 }
 0xf72   :  { %1317 = vpow2.f32 %v1273_v4 }
 0xf7f   :  { %v1318_v6 = vpop.eup %1317 }
 0xf80   :  { %v889_v7 = vadd.f32 1.0, %v1318_v6 }
 0xf82   :  { %1319 = vrcp.f32 %v889_v7 }
 0xf8f   :  { %v1320_v8 = vpop.eup %1319 }
 0xf90   :  { %v892_v9 = vmul.f32 2.0, %v1320_v8  ;;  %v894_v20 = vmul.f32 %v1320_v8, %v2033_v47 }
 0xf92   :  { %v1274_v15 = vadd.f32 -1.0, %v892_v9 }
 0xf94   :  { %896 = vrot.lane.b32.xlu0 %v1274_v15, %s1378_s12 }
0x1006   :  { %v897_v17 = vpop.permute.xlu0 %896 }
0x1007   :  { %v899_v19 = vmul.f32 %v1320_v8, %v897_v17 }
0x1009   :  { %901 = vrot.lane.b32.xlu1 %v899_v19, %s1379_s13 }
0x107b   :  { %v902_v10 = vpop.permute.xlu1 %901 }
0x107c   :  { %v2074_v21 = vadd.f32 %v902_v10, %v894_v20 }
0x107e   :  { %1321 = vtanh.f32 %v2074_v21  ;;  %v1224_v17 = vrot.slane %v2074_v21, 2 }
0x108b   :  { %v1322_v22 = vpop.eup %1321 }
0x108c   :  { %907 = vrot.lane.b32.xlu0 %v1322_v22, %s1378_s12 }
0x10fe   :  { %v908_v23 = vpop.permute.xlu0 %907 }
0x10ff   :  { %v910_v24 = vmul.f32 %v1320_v8, %v908_v23 }
0x1101   :  { %v1104_v26 = vcombine.high %v910_v24, %v910_v24  ;;  %v918_v27 = vrot.slane %v910_v24, 4  ;;  %v912_v28 = vrot.slane %v910_v24, 2 }
0x1103   :  { %v1111_v29 = vrot.slane %v1104_v26, %v1885_v48  ;;  %919 = vrot.lane.b32.xlu0 %v918_v27, %s1378_s12  ;;  %915 = vrot.lane.b32.xlu1 %v912_v28, %s1379_s13  ;;  %v914_v46 = vsel %vm64_vm6, %v793_v14, %v912_v28 }
0x1104   :  { %v924_v49 = vrot.slane %v914_v46, 6 }
0x1105   :  { %v1112_v30 = vcombine.high %v1111_v29, %v1111_v29  ;;  %v1119_v31 = vrot.slane %v1111_v29, %v1885_v48 }
0x1106   :  { %v929_v58 = vsel %vm119_vm0, %v787_v51, %v924_v49 }
0x1107   :  { %v1174_v32 = vrot.slane %v1119_v31, %v1707_v2  ;;  %v1126_v13 = vrot.slane %v1112_v30, %v1885_v48  ;;  %v930_v61 = vsel %vm122_vm1, %v929_v58, %v1649_v56 }
0x1109   :  { %v1197_v33 = vsel %vm1196_vm12, %v1194_v63, %v1174_v32  ;;  %v1178_v0 = vrot.slane %v1126_v13, %v1707_v2 }
0x110b   :  { %v1198_v34 = vsel %vm1196_vm12, %v1195_v57, %v1178_v0 }
0x1175   :  { %v920_v59 = vpop.permute.xlu0 %919  ;;  %v916_v62 = vpop.permute.xlu1 %915 }
0x1176   :  { %v922_v43 = vsel %vm91_vm3, %v916_v62, %v920_v59  ;;  %1221 = vst.msk [vmem:[%s2158_s6 + $0x2] sm:$0x3] %vm1219_vm13, %v916_v62 }
0x1177   :  { %v927_v25 = vrot.slane %v922_v43, 4 }
0x1179   :  { %v931_v60 = vsel %vm122_vm1, %v1631_v45, %v927_v25 }
0x117a   :  { %1275 = vmatprep.mubr.msk.f32.mxu0 %vm62_vm5, %v931_v60 }
0x117b   :  { %1000 = vmatmul.mubr.f32.vlgmr.msra.gmra.mxu0 %v930_v61 }
0x123b   :  { %v1001_v52 = vpop.f32.mrf.mxu0 }
0x123c   :  { %v1002_v63 = vadd.f32 %v1351_v54, %v1001_v52 }
0x123d   :  { %v1003_v1 = vpop.f32.mrf.mxu0 }
0x123e   :  { %v1005_v57 = vmul.f32 %v1002_v63, %v1716_v16  ;;  %v1014_v16 = vsel %vm119_vm0, %v2033_v47, %v2074_v21 }
0x123f   :  { %v1015_v55 = vsel %vm122_vm1, %v1014_v16, %v2074_v21 }
0x1240   :  { %v1276_v12 = vmul.f32 -1.442695, %v1005_v57 }
0x1242   :  { %1323 = vpow2.f32 %v1276_v12 }
0x124f   :  { %v1324_v14 = vpop.eup %1323 }
0x1250   :  { %v1009_v40 = vadd.f32 1.0, %v1324_v14 }
0x1252   :  { %1325 = vrcp.f32 %v1009_v40 }
0x125f   :  { %v1326_v45 = vpop.eup %1325 }
0x1260   :  { %v1012_v41 = vmul.f32 2.0, %v1326_v45  ;;  %v1016_v38 = vmul.f32 %v1326_v45, %v1015_v55 }
0x1262   :  { %v1277_v18 = vadd.f32 -1.0, %v1012_v41 }
0x1264   :  { %1018 = vrot.lane.b32.xlu1 %v1277_v18, %s1378_s12 }
0x12d6   :  { %v1019_v56 = vpop.permute.xlu1 %1018 }
0x12d7   :  { %v1021_v35 = vmul.f32 %v1326_v45, %v1019_v56 }
0x12d9   :  { %1023 = vrot.lane.b32.xlu0 %v1021_v35, %s1379_s13 }
0x12dd   :  { %1213 = vrot.lane.b32.xlu0 %v2037_v53, %s1379_s13 }
0x12e1   :  { %1228 = vrot.lane.b32.xlu0 %v2033_v47, %s1380_s15 }
0x134b   :  { %v1024_v36 = vpop.permute.xlu0 %1023 }
0x134c   :  { %v1026_v37 = vadd.f32 %v1024_v36, %v1016_v38 }
0x134e   :  { %1327 = vtanh.f32 %v1026_v37  ;;  %v1226_v15 = vrot.slane %v1026_v37, 4 }
0x134f   :  { %v1214_v51 = vpop.permute.xlu0 %1213 }
0x1350   :  { %1220 = vst.msk [vmem:[%s2158_s6] sm:$0x3] %vm1219_vm13, %v1214_v51 }
0x1353   :  { %v1229_v53 = vpop.permute.xlu0 %1228 }
0x1354   :  { %1237 = vst.msk [vmem:[%s2159_s7] sm:$0x3] %vm1219_vm13, %v1229_v53 }
0x135b   :  { %v1328_v47 = vpop.eup %1327 }
0x135c   :  { %1029 = vrot.lane.b32.xlu1 %v1328_v47, %s1378_s12 }
0x13ce   :  { %v1030_v39 = vpop.permute.xlu1 %1029 }
0x13cf   :  { %v1032_v5 = vmul.f32 %v1326_v45, %v1030_v39 }
0x13d1   :  { %v1128_v11 = vcombine.high %v1032_v5, %v1032_v5  ;;  %v1212_v50 = vrot.slane %v1032_v5, 4 }
0x13d3   :  { %v1135_v42 = vrot.slane %v1128_v11, %v1885_v48  ;;  %1215 = vrot.lane.b32.xlu1 %v1212_v50, %s1379_s13 }
0x13d5   :  { %v1136_v44 = vcombine.high %v1135_v42, %v1135_v42  ;;  %v1143_v3 = vrot.slane %v1135_v42, %v1885_v48 }
0x13d7   :  { %v1184_v4 = vrot.slane %v1143_v3, %v1707_v2  ;;  %v1150_v6 = vrot.slane %v1136_v44, %v1885_v48 }
0x13d9   :  { %v1199_v7 = vsel %vm122_vm1, %v1197_v33, %v1184_v4  ;;  %v1188_v8 = vrot.slane %v1150_v6, %v1707_v2 }
0x13da   :  { %1203 = vrot.lane.b32.xlu0 %v1199_v7, %s1379_s13 }
0x13db   :  { %v1200_v9 = vsel %vm122_vm1, %v1198_v34, %v1188_v8 }
0x13dc   :  { %1205 = vrot.lane.b32.xlu1 %v1200_v9, %s1379_s13 }
0x13de   :  { %1232 = vrot.lane.b32.xlu0 %v1226_v15, %s1380_s15 }
0x13e0   :  { %1230 = vrot.lane.b32.xlu1 %v1224_v17, %s1380_s15 }
0x1445   :  { %v1216_v19 = vpop.permute.xlu1 %1215 }
0x1446   :  { %1222 = vst.msk [vmem:[%s2158_s6 + $0x4] sm:$0x3] %vm1219_vm13, %v1216_v19 }
0x144c   :  { %v1204_v2 = vpop.permute.xlu0 %1203 }
0x144d   :  { %1210 = vst.msk [vmem:[%s2157_s5] sm:$0x1f] %vm1209_vm14, %v1204_v2 }
0x144e   :  { %v1206_v48 = vpop.permute.xlu1 %1205 }
0x144f   :  { %1211 = vst.msk [vmem:[%s2157_s5 + $0x8] sm:$0x1f] %vm1209_vm14, %v1206_v48 }
0x1450   :  { %v1233_v20 = vpop.permute.xlu0 %1232 }
0x1451   :  { %1239 = vst.msk [vmem:[%s2159_s7 + $0x4] sm:$0x3] %vm1219_vm13, %v1233_v20 }
0x1452   :  { %v1231_v10 = vpop.permute.xlu1 %1230 }
0x1453   :  { %1238 = vst.msk [vmem:[%s2159_s7 + $0x2] sm:$0x3] %vm1219_vm13, %v1231_v10 }
0x1454   :  { %1252 = vsyncpa [#allocation3], 1 }

</bundles_post_ra>
